<compile_context>
chip_gen: v7x
topology: tpu7x:2x2x1
jax: 0.10.0
libtpu: 0.0.40
codegen_flags: <defaults>
</compile_context>

<pallas_src>
import jax
import jax.numpy as jnp
from jax.experimental import pallas as pl
from jax.experimental.pallas import tpu as pltpu


# ----------------------------- fused kernel ---------------------------------
def actor_b_kernel(x_ref, y_ref, wih_ref, whh_ref, bi_ref, bhn_ref,
                   w1_ref, b1_ref, w2s_ref, w2y_ref, b2_ref, w3_ref, b3_ref,
                   o_ref, xp_ref):
    # x_ref:   (L*N, D)   time-major flattened input (row t*N+n = step t, batch n), bf16
    # y_ref:   (N, K, E)  action embeddings, bf16
    # wih_ref: (D, 3*GP)  fused input->hidden weights, gate g in lanes [g*GP, g*GP+H), bf16
    # whh_ref: (H, 3*GP)  fused hidden->hidden weights, bf16
    # bi_ref:  (1, 3*GP)  folded biases [bir+bhr | biz+bhz | bin], f32
    # bhn_ref: (1, H)     hidden bias of the n gate (stays inside r*(..)), f32
    # w1/w2s/w2y: bf16 MLP weights; b1/b2/w3/b3: f32
    # o_ref:   (N, K)     f32 logits;   xp_ref: (L*N, 3*GP) f32 VMEM scratch
    LN, _ = x_ref.shape
    H = whh_ref.shape[0]
    GP = whh_ref.shape[1] // 3
    N, K, E = y_ref.shape
    L = LN // N

    # ---- hoisted input projection: one MXU matmul for all timesteps ----
    xp_ref[...] = (
        jnp.dot(x_ref[...], wih_ref[...], preferred_element_type=jnp.float32)
        + bi_ref[...])

    whh = whh_ref[...]          # reused by every step
    bhn = bhn_ref[...]

    # ---- GRU recurrence, fully unrolled (L is small & static) ----
    h = jnp.zeros((N, H), jnp.float32)
    for t in range(L):
        r0 = t * N
        hp = jnp.dot(h.astype(jnp.bfloat16), whh,
                     preferred_element_type=jnp.float32)               # (N, 3*GP)
        r = jax.nn.sigmoid(xp_ref[r0:r0 + N, 0:H] + hp[:, 0:H])
        z = jax.nn.sigmoid(xp_ref[r0:r0 + N, GP:GP + H] + hp[:, GP:GP + H])
        n = jnp.tanh(xp_ref[r0:r0 + N, 2 * GP:2 * GP + H]
                     + r * (hp[:, 2 * GP:2 * GP + H] + bhn))
        h = (1.0 - z) * n + z * h

    # ---- MLP head: fc1 -> fc2 (split over [state | y]) -> fc3 ----
    s = jnp.maximum(
        jnp.dot(h.astype(jnp.bfloat16), w1_ref[...],
                preferred_element_type=jnp.float32) + b1_ref[...], 0.0)    # (N, Hd)
    s2 = jnp.dot(s.astype(jnp.bfloat16), w2s_ref[...],
                 preferred_element_type=jnp.float32) + b2_ref[...]         # (N, Hd)
    w2y = w2y_ref[...]
    w3 = w3_ref[...]
    for b in range(N):                       # N is tiny & static; no grid steps needed
        u = jnp.maximum(
            jnp.dot(y_ref[b], w2y, preferred_element_type=jnp.float32)
            + s2[b:b + 1, :], 0.0)                                         # (K, Hd)
        # fc3 (output dim 1) as a lane reduction against the w3 row vector
        o_ref[b:b + 1, :] = jnp.sum(u * w3, axis=-1)[None, :] + b3_ref[...]


# ----------------------------- wrapper ---------------------------------------
def _pad_gates(w, H, GP):
    # (3, A, H) -> (A, 3*GP) with gate g occupying lanes [g*GP, g*GP + H)
    A = w.shape[1]
    out = jnp.zeros((A, 3 * GP), w.dtype)
    for g in range(3):
        out = out.at[:, g * GP:g * GP + H].set(w[g])
    return out


@jax.jit
def actor_b_forward(x, y, p):
    # x: (N, L, D) batch-first (PyTorch convention); y: (N, K, E) -> logits (N, K)
    N, L, D = x.shape
    _, K, E = y.shape
    H = p["whh"].shape[2]
    Hd = p["w1"].shape[1]
    GP = ((H + 127) // 128) * 128
    bf = jnp.bfloat16

    # time-major rows: step t owns rows [t*N, (t+1)*N)
    x_tm = jnp.transpose(x, (1, 0, 2)).reshape(L * N, D).astype(bf)

    wih_p = _pad_gates(p["wih"], H, GP).astype(bf)            # (D, 3*GP)
    whh_p = _pad_gates(p["whh"], H, GP).astype(bf)            # (H, 3*GP)

    bi = jnp.zeros((1, 3 * GP), jnp.float32)
    bi = bi.at[:, 0:H].set(p["bih"][0] + p["bhh"][0])         # r gate: fold biases
    bi = bi.at[:, GP:GP + H].set(p["bih"][1] + p["bhh"][1])   # z gate: fold biases
    bi = bi.at[:, 2 * GP:2 * GP + H].set(p["bih"][2])         # n gate: input bias only
    bhn = p["bhh"][2]                                         # (1, H)

    y_bf = y.astype(bf)
    w1 = p["w1"].astype(bf)
    w2s = p["w2s"].astype(bf)
    w2y = p["w2y"].astype(bf)

    return pl.pallas_call(
        actor_b_kernel,
        out_shape=jax.ShapeDtypeStruct((N, K), jnp.float32),
        grid=(1,),
        in_specs=[
            pl.BlockSpec((L * N, D), lambda i: (0, 0)),        # x (time-major, flat)
            pl.BlockSpec((N, K, E), lambda i: (0, 0, 0)),      # y
            pl.BlockSpec((D, 3 * GP), lambda i: (0, 0)),       # fused Wih
            pl.BlockSpec((H, 3 * GP), lambda i: (0, 0)),       # fused Whh
            pl.BlockSpec((1, 3 * GP), lambda i: (0, 0)),       # folded input-side biases
            pl.BlockSpec((1, H), lambda i: (0, 0)),            # bhn
            pl.BlockSpec((H, Hd), lambda i: (0, 0)),           # w1
            pl.BlockSpec((1, Hd), lambda i: (0, 0)),           # b1
            pl.BlockSpec((Hd, Hd), lambda i: (0, 0)),          # w2 (state part)
            pl.BlockSpec((E, Hd), lambda i: (0, 0)),           # w2 (action part)
            pl.BlockSpec((1, Hd), lambda i: (0, 0)),           # b2
            pl.BlockSpec((1, Hd), lambda i: (0, 0)),           # w3 (row vector)
            pl.BlockSpec((1, 1), lambda i: (0, 0)),            # b3
        ],
        out_specs=pl.BlockSpec((N, K), lambda i: (0, 0)),
        scratch_shapes=[pltpu.VMEM((L * N, 3 * GP), jnp.float32)],
    )(x_tm, y_bf, wih_p, whh_p, bi, bhn,
      w1, p["b1"], w2s, w2y, p["b2"], p["w3"], p["b3"])


# ----------------------------- pure-JAX reference ---------------------------
def reference_forward(x, y, p):
    bf = jnp.bfloat16

    def mm(a, b):  # same bf16-operand / f32-accumulate math as the kernel
        return jnp.dot(a.astype(bf), b.astype(bf), preferred_element_type=jnp.float32)

    N, L, D = x.shape
    H = p["whh"].shape[1]
    h = jnp.zeros((N, H), jnp.float32)
    for t in range(L):
        xt = x[:, t, :]
        r = jax.nn.sigmoid(mm(xt, p["wih"][0]) + p["bih"][0] + mm(h, p["whh"][0]) + p["bhh"][0])
        z = jax.nn.sigmoid(mm(xt, p["wih"][1]) + p["bih"][1] + mm(h, p["whh"][1]) + p["bhh"][1])
        n = jnp.tanh(mm(xt, p["wih"][2]) + p["bih"][2] + r * (mm(h, p["whh"][2]) + p["bhh"][2]))
        h = (1.0 - z) * n + z * h
    s = jax.nn.relu(mm(h, p["w1"]) + p["b1"])                       # (N, Hd)
    s2 = mm(s, p["w2s"]) + p["b2"]                                  # (N, Hd)
    K, E = y.shape[1], y.shape[2]
    u = jax.nn.relu(mm(y.reshape(N * K, E), p["w2y"]).reshape(N, K, -1) + s2[:, None, :])
    logits = jnp.sum(u * p["w3"][0][None, None, :], axis=-1) + p["b3"][0, 0]
    return logits


# ----------------------------- parameter init -------------------------------
def init_params(key, x_dim, state_dim, hidden_dim, emb_size):
    ks = jax.random.split(key, 12)
    u = lambda k, shape, scale: jax.random.uniform(k, shape, jnp.float32, -scale, scale)
    sH = 1.0 / jnp.sqrt(state_dim)
    sHd = 1.0 / jnp.sqrt(hidden_dim)
    sC = 1.0 / jnp.sqrt(hidden_dim + emb_size)
    return {
        # GRU (layer_num=1), gate order (r, z, n) as in PyTorch
        "wih": u(ks[0], (3, x_dim, state_dim), sH),
        "whh": u(ks[1], (3, state_dim, state_dim), sH),
        "bih": u(ks[2], (3, 1, state_dim), sH),
        "bhh": u(ks[3], (3, 1, state_dim), sH),
        # fc1: state_dim -> hidden_dim
        "w1": u(ks[4], (state_dim, hidden_dim), sH),
        "b1": u(ks[5], (1, hidden_dim), sH),
        # fc2: (hidden_dim + emb_size) -> hidden_dim, split into state / y parts
        "w2s": u(ks[6], (hidden_dim, hidden_dim), sC),
        "w2y": u(ks[7], (emb_size, hidden_dim), sC),
        "b2": u(ks[8], (1, hidden_dim), sC),
        # fc3: hidden_dim -> 1 (stored as a row vector)
        "w3": u(ks[9], (1, hidden_dim), sHd),
        "b3": u(ks[10], (1, 1), sHd),
    }


if __name__ == "__main__":
    # N batch, L seq, D=x_dim, K action-set length, E=emb_size
    N, L, K = 2, 8, 6
    x_dim, state_dim, hidden_dim, emb_size = 50, 50, 50, 16

    key = jax.random.PRNGKey(0)
    kx, ky, kp = jax.random.split(key, 3)
    x = jax.random.normal(kx, (N, L, x_dim), jnp.float32)
    y = jax.random.normal(ky, (N, K, emb_size), jnp.float32)
    params = init_params(kp, x_dim, state_dim, hidden_dim, emb_size)

    logits = jax.block_until_ready(actor_b_forward(x, y, params))
    ref = jax.block_until_ready(reference_forward(x, y, params))

    assert logits.shape == (N, K), logits.shape
    assert jnp.allclose(logits, ref, rtol=2e-3, atol=2e-3), (logits, ref)
    print("KERNEL_OK")
</pallas_src>

<mosaic_0001>
module attributes {stable_mosaic.version = 11 : i64} {
  func.func @actor_b_kernel(%arg0: i32, %arg1: memref<16x50xbf16, #tpu.memory_space<vmem>>, %arg2: memref<2x6x16xbf16, #tpu.memory_space<vmem>>, %arg3: memref<50x384xbf16, #tpu.memory_space<vmem>>, %arg4: memref<50x384xbf16, #tpu.memory_space<vmem>>, %arg5: memref<1x384xf32, #tpu.memory_space<vmem>>, %arg6: memref<1x50xf32, #tpu.memory_space<vmem>>, %arg7: memref<50x50xbf16, #tpu.memory_space<vmem>>, %arg8: memref<1x50xf32, #tpu.memory_space<vmem>>, %arg9: memref<50x50xbf16, #tpu.memory_space<vmem>>, %arg10: memref<16x50xbf16, #tpu.memory_space<vmem>>, %arg11: memref<1x50xf32, #tpu.memory_space<vmem>>, %arg12: memref<1x50xf32, #tpu.memory_space<vmem>>, %arg13: memref<1x1xf32, #tpu.memory_space<vmem>>, %arg14: memref<2x6xf32, #tpu.memory_space<vmem>>, %arg15: memref<16x384xf32, #tpu.memory_space<vmem>>) attributes {dimension_semantics = [#tpu.dimension_semantics<arbitrary>], iteration_bounds = array<i64: 1>, scalar_prefetch = 0 : i64, scratch_operands = 1 : i64, tpu.core_type = #tpu.core_type<tc>, window_params = [{pipeline_mode = #tpu.pipeline_mode<synchronous>, transform_indices = @transform_0, window_bounds = array<i64: 16, 50>}, {pipeline_mode = #tpu.pipeline_mode<synchronous>, transform_indices = @transform_1, window_bounds = array<i64: 2, 6, 16>}, {pipeline_mode = #tpu.pipeline_mode<synchronous>, transform_indices = @transform_2, window_bounds = array<i64: 50, 384>}, {pipeline_mode = #tpu.pipeline_mode<synchronous>, transform_indices = @transform_3, window_bounds = array<i64: 50, 384>}, {pipeline_mode = #tpu.pipeline_mode<synchronous>, transform_indices = @transform_4, window_bounds = array<i64: 1, 384>}, {pipeline_mode = #tpu.pipeline_mode<synchronous>, transform_indices = @transform_5, window_bounds = array<i64: 1, 50>}, {pipeline_mode = #tpu.pipeline_mode<synchronous>, transform_indices = @transform_6, window_bounds = array<i64: 50, 50>}, {pipeline_mode = #tpu.pipeline_mode<synchronous>, transform_indices = @transform_7, window_bounds = array<i64: 1, 50>}, {pipeline_mode = #tpu.pipeline_mode<synchronous>, transform_indices = @transform_8, window_bounds = array<i64: 50, 50>}, {pipeline_mode = #tpu.pipeline_mode<synchronous>, transform_indices = @transform_9, window_bounds = array<i64: 16, 50>}, {pipeline_mode = #tpu.pipeline_mode<synchronous>, transform_indices = @transform_10, window_bounds = array<i64: 1, 50>}, {pipeline_mode = #tpu.pipeline_mode<synchronous>, transform_indices = @transform_11, window_bounds = array<i64: 1, 50>}, {pipeline_mode = #tpu.pipeline_mode<synchronous>, transform_indices = @transform_12, window_bounds = array<i64: 1, 1>}, {pipeline_mode = #tpu.pipeline_mode<synchronous>, transform_indices = @transform_13, window_bounds = array<i64: 2, 6>}]} {
    %c0 = arith.constant 0 : index
    %c0_0 = arith.constant 0 : index
    %0 = vector.load %arg1[%c0, %c0_0] : memref<16x50xbf16, #tpu.memory_space<vmem>>, vector<16x50xbf16>
    %c0_1 = arith.constant 0 : index
    %c0_2 = arith.constant 0 : index
    %1 = vector.load %arg3[%c0_1, %c0_2] : memref<50x384xbf16, #tpu.memory_space<vmem>>, vector<50x384xbf16>
    %cst = arith.constant dense<0.000000e+00> : vector<16x384xf32>
    %2 = tpu.matmul %0, %1, %cst {dimension_numbers = #tpu.dot_dimension_numbers<[1], [0], [0], [1], [0, 0, 1, 1], [], []>} : vector<16x50xbf16>, vector<50x384xbf16>, vector<16x384xf32> -> vector<16x384xf32>
    %c0_3 = arith.constant 0 : index
    %c0_4 = arith.constant 0 : index
    %3 = vector.load %arg5[%c0_3, %c0_4] : memref<1x384xf32, #tpu.memory_space<vmem>>, vector<1x384xf32>
    %4 = vector.broadcast %3 : vector<1x384xf32> to vector<16x384xf32>
    %5 = arith.addf %2, %4 : vector<16x384xf32>
    %c0_5 = arith.constant 0 : index
    %c0_6 = arith.constant 0 : index
    %6 = vector.load %arg15[%c0_5, %c0_6] : memref<16x384xf32, #tpu.memory_space<vmem>>, vector<16x384xf32>
    tpu.vector_store %arg15[%c0_5, %c0_6], %5 {strides = array<i32>} : memref<16x384xf32, #tpu.memory_space<vmem>>, vector<16x384xf32>,
    %c0_7 = arith.constant 0 : index
    %c0_8 = arith.constant 0 : index
    %7 = vector.load %arg4[%c0_7, %c0_8] : memref<50x384xbf16, #tpu.memory_space<vmem>>, vector<50x384xbf16>
    %c0_9 = arith.constant 0 : index
    %c0_10 = arith.constant 0 : index
    %8 = vector.load %arg6[%c0_9, %c0_10] : memref<1x50xf32, #tpu.memory_space<vmem>>, vector<1x50xf32>
    %cst_11 = arith.constant 0.000000e+00 : f32
    %9 = vector.broadcast %cst_11 : f32 to vector<2x50xf32>
    %10 = arith.truncf %9 : vector<2x50xf32> to vector<2x50xbf16>
    %cst_12 = arith.constant dense<0.000000e+00> : vector<2x384xf32>
    %11 = tpu.matmul %10, %7, %cst_12 {dimension_numbers = #tpu.dot_dimension_numbers<[1], [0], [0], [1], [0, 0, 1, 1], [], []>} : vector<2x50xbf16>, vector<50x384xbf16>, vector<2x384xf32> -> vector<2x384xf32>
    %c0_13 = arith.constant 0 : index
    %c0_14 = arith.constant 0 : index
    %12 = vector.load %arg15[%c0_13, %c0_14] : memref<16x384xf32, #tpu.memory_space<vmem>>, vector<2x50xf32>
    %13 = vector.extract_strided_slice %11 {offsets = [0, 0], sizes = [2, 50], strides = [1, 1]} : vector<2x384xf32> to vector<2x50xf32>
    %14 = arith.addf %12, %13 : vector<2x50xf32>
    %15 = arith.negf %14 : vector<2x50xf32>
    %16 = math.exp %15 : vector<2x50xf32>
    %cst_15 = arith.constant 1.000000e+00 : f32
    %17 = vector.broadcast %cst_15 : f32 to vector<2x50xf32>
    %18 = arith.addf %17, %16 : vector<2x50xf32>
    %19 = arith.divf %17, %18 : vector<2x50xf32>
    %c0_16 = arith.constant 0 : index
    %c128 = arith.constant 128 : index
    %20 = vector.load %arg15[%c0_16, %c128] : memref<16x384xf32, #tpu.memory_space<vmem>>, vector<2x50xf32>
    %21 = vector.extract_strided_slice %11 {offsets = [0, 128], sizes = [2, 50], strides = [1, 1]} : vector<2x384xf32> to vector<2x50xf32>
    %22 = arith.addf %20, %21 : vector<2x50xf32>
    %23 = arith.negf %22 : vector<2x50xf32>
    %24 = math.exp %23 : vector<2x50xf32>
    %cst_17 = arith.constant 1.000000e+00 : f32
    %25 = vector.broadcast %cst_17 : f32 to vector<2x50xf32>
    %26 = arith.addf %25, %24 : vector<2x50xf32>
    %27 = arith.divf %25, %26 : vector<2x50xf32>
    %c0_18 = arith.constant 0 : index
    %c256 = arith.constant 256 : index
    %28 = vector.load %arg15[%c0_18, %c256] : memref<16x384xf32, #tpu.memory_space<vmem>>, vector<2x50xf32>
    %29 = vector.extract_strided_slice %11 {offsets = [0, 256], sizes = [2, 50], strides = [1, 1]} : vector<2x384xf32> to vector<2x50xf32>
    %30 = vector.broadcast %8 : vector<1x50xf32> to vector<2x50xf32>
    %31 = arith.addf %29, %30 : vector<2x50xf32>
    %32 = arith.mulf %19, %31 : vector<2x50xf32>
    %33 = arith.addf %28, %32 : vector<2x50xf32>
    %34 = math.tanh %33 : vector<2x50xf32>
    %cst_19 = arith.constant 1.000000e+00 : f32
    %35 = vector.broadcast %cst_19 : f32 to vector<2x50xf32>
    %36 = arith.subf %35, %27 : vector<2x50xf32>
    %37 = arith.mulf %36, %34 : vector<2x50xf32>
    %38 = arith.mulf %27, %9 : vector<2x50xf32>
    %39 = arith.addf %37, %38 : vector<2x50xf32>
    %40 = arith.truncf %39 : vector<2x50xf32> to vector<2x50xbf16>
    %cst_20 = arith.constant dense<0.000000e+00> : vector<2x384xf32>
    %41 = tpu.matmul %40, %7, %cst_20 {dimension_numbers = #tpu.dot_dimension_numbers<[1], [0], [0], [1], [0, 0, 1, 1], [], []>} : vector<2x50xbf16>, vector<50x384xbf16>, vector<2x384xf32> -> vector<2x384xf32>
    %c2 = arith.constant 2 : index
    %c0_21 = arith.constant 0 : index
    %42 = vector.load %arg15[%c2, %c0_21] : memref<16x384xf32, #tpu.memory_space<vmem>>, vector<2x50xf32>
    %43 = vector.extract_strided_slice %41 {offsets = [0, 0], sizes = [2, 50], strides = [1, 1]} : vector<2x384xf32> to vector<2x50xf32>
    %44 = arith.addf %42, %43 : vector<2x50xf32>
    %45 = arith.negf %44 : vector<2x50xf32>
    %46 = math.exp %45 : vector<2x50xf32>
    %cst_22 = arith.constant 1.000000e+00 : f32
    %47 = vector.broadcast %cst_22 : f32 to vector<2x50xf32>
    %48 = arith.addf %47, %46 : vector<2x50xf32>
    %49 = arith.divf %47, %48 : vector<2x50xf32>
    %c2_23 = arith.constant 2 : index
    %c128_24 = arith.constant 128 : index
    %50 = vector.load %arg15[%c2_23, %c128_24] : memref<16x384xf32, #tpu.memory_space<vmem>>, vector<2x50xf32>
    %51 = vector.extract_strided_slice %41 {offsets = [0, 128], sizes = [2, 50], strides = [1, 1]} : vector<2x384xf32> to vector<2x50xf32>
    %52 = arith.addf %50, %51 : vector<2x50xf32>
    %53 = arith.negf %52 : vector<2x50xf32>
    %54 = math.exp %53 : vector<2x50xf32>
    %cst_25 = arith.constant 1.000000e+00 : f32
    %55 = vector.broadcast %cst_25 : f32 to vector<2x50xf32>
    %56 = arith.addf %55, %54 : vector<2x50xf32>
    %57 = arith.divf %55, %56 : vector<2x50xf32>
    %c2_26 = arith.constant 2 : index
    %c256_27 = arith.constant 256 : index
    %58 = vector.load %arg15[%c2_26, %c256_27] : memref<16x384xf32, #tpu.memory_space<vmem>>, vector<2x50xf32>
    %59 = vector.extract_strided_slice %41 {offsets = [0, 256], sizes = [2, 50], strides = [1, 1]} : vector<2x384xf32> to vector<2x50xf32>
    %60 = vector.broadcast %8 : vector<1x50xf32> to vector<2x50xf32>
    %61 = arith.addf %59, %60 : vector<2x50xf32>
    %62 = arith.mulf %49, %61 : vector<2x50xf32>
    %63 = arith.addf %58, %62 : vector<2x50xf32>
    %64 = math.tanh %63 : vector<2x50xf32>
    %cst_28 = arith.constant 1.000000e+00 : f32
    %65 = vector.broadcast %cst_28 : f32 to vector<2x50xf32>
    %66 = arith.subf %65, %57 : vector<2x50xf32>
    %67 = arith.mulf %66, %64 : vector<2x50xf32>
    %68 = arith.mulf %57, %39 : vector<2x50xf32>
    %69 = arith.addf %67, %68 : vector<2x50xf32>
    %70 = arith.truncf %69 : vector<2x50xf32> to vector<2x50xbf16>
    %cst_29 = arith.constant dense<0.000000e+00> : vector<2x384xf32>
    %71 = tpu.matmul %70, %7, %cst_29 {dimension_numbers = #tpu.dot_dimension_numbers<[1], [0], [0], [1], [0, 0, 1, 1], [], []>} : vector<2x50xbf16>, vector<50x384xbf16>, vector<2x384xf32> -> vector<2x384xf32>
    %c4 = arith.constant 4 : index
    %c0_30 = arith.constant 0 : index
    %72 = vector.load %arg15[%c4, %c0_30] : memref<16x384xf32, #tpu.memory_space<vmem>>, vector<2x50xf32>
    %73 = vector.extract_strided_slice %71 {offsets = [0, 0], sizes = [2, 50], strides = [1, 1]} : vector<2x384xf32> to vector<2x50xf32>
    %74 = arith.addf %72, %73 : vector<2x50xf32>
    %75 = arith.negf %74 : vector<2x50xf32>
    %76 = math.exp %75 : vector<2x50xf32>
    %cst_31 = arith.constant 1.000000e+00 : f32
    %77 = vector.broadcast %cst_31 : f32 to vector<2x50xf32>
    %78 = arith.addf %77, %76 : vector<2x50xf32>
    %79 = arith.divf %77, %78 : vector<2x50xf32>
    %c4_32 = arith.constant 4 : index
    %c128_33 = arith.constant 128 : index
    %80 = vector.load %arg15[%c4_32, %c128_33] : memref<16x384xf32, #tpu.memory_space<vmem>>, vector<2x50xf32>
    %81 = vector.extract_strided_slice %71 {offsets = [0, 128], sizes = [2, 50], strides = [1, 1]} : vector<2x384xf32> to vector<2x50xf32>
    %82 = arith.addf %80, %81 : vector<2x50xf32>
    %83 = arith.negf %82 : vector<2x50xf32>
    %84 = math.exp %83 : vector<2x50xf32>
    %cst_34 = arith.constant 1.000000e+00 : f32
    %85 = vector.broadcast %cst_34 : f32 to vector<2x50xf32>
    %86 = arith.addf %85, %84 : vector<2x50xf32>
    %87 = arith.divf %85, %86 : vector<2x50xf32>
    %c4_35 = arith.constant 4 : index
    %c256_36 = arith.constant 256 : index
    %88 = vector.load %arg15[%c4_35, %c256_36] : memref<16x384xf32, #tpu.memory_space<vmem>>, vector<2x50xf32>
    %89 = vector.extract_strided_slice %71 {offsets = [0, 256], sizes = [2, 50], strides = [1, 1]} : vector<2x384xf32> to vector<2x50xf32>
    %90 = vector.broadcast %8 : vector<1x50xf32> to vector<2x50xf32>
    %91 = arith.addf %89, %90 : vector<2x50xf32>
    %92 = arith.mulf %79, %91 : vector<2x50xf32>
    %93 = arith.addf %88, %92 : vector<2x50xf32>
    %94 = math.tanh %93 : vector<2x50xf32>
    %cst_37 = arith.constant 1.000000e+00 : f32
    %95 = vector.broadcast %cst_37 : f32 to vector<2x50xf32>
    %96 = arith.subf %95, %87 : vector<2x50xf32>
    %97 = arith.mulf %96, %94 : vector<2x50xf32>
    %98 = arith.mulf %87, %69 : vector<2x50xf32>
    %99 = arith.addf %97, %98 : vector<2x50xf32>
    %100 = arith.truncf %99 : vector<2x50xf32> to vector<2x50xbf16>
    %cst_38 = arith.constant dense<0.000000e+00> : vector<2x384xf32>
    %101 = tpu.matmul %100, %7, %cst_38 {dimension_numbers = #tpu.dot_dimension_numbers<[1], [0], [0], [1], [0, 0, 1, 1], [], []>} : vector<2x50xbf16>, vector<50x384xbf16>, vector<2x384xf32> -> vector<2x384xf32>
    %c6 = arith.constant 6 : index
    %c0_39 = arith.constant 0 : index
    %102 = vector.load %arg15[%c6, %c0_39] : memref<16x384xf32, #tpu.memory_space<vmem>>, vector<2x50xf32>
    %103 = vector.extract_strided_slice %101 {offsets = [0, 0], sizes = [2, 50], strides = [1, 1]} : vector<2x384xf32> to vector<2x50xf32>
    %104 = arith.addf %102, %103 : vector<2x50xf32>
    %105 = arith.negf %104 : vector<2x50xf32>
    %106 = math.exp %105 : vector<2x50xf32>
    %cst_40 = arith.constant 1.000000e+00 : f32
    %107 = vector.broadcast %cst_40 : f32 to vector<2x50xf32>
    %108 = arith.addf %107, %106 : vector<2x50xf32>
    %109 = arith.divf %107, %108 : vector<2x50xf32>
    %c6_41 = arith.constant 6 : index
    %c128_42 = arith.constant 128 : index
    %110 = vector.load %arg15[%c6_41, %c128_42] : memref<16x384xf32, #tpu.memory_space<vmem>>, vector<2x50xf32>
    %111 = vector.extract_strided_slice %101 {offsets = [0, 128], sizes = [2, 50], strides = [1, 1]} : vector<2x384xf32> to vector<2x50xf32>
    %112 = arith.addf %110, %111 : vector<2x50xf32>
    %113 = arith.negf %112 : vector<2x50xf32>
    %114 = math.exp %113 : vector<2x50xf32>
    %cst_43 = arith.constant 1.000000e+00 : f32
    %115 = vector.broadcast %cst_43 : f32 to vector<2x50xf32>
    %116 = arith.addf %115, %114 : vector<2x50xf32>
    %117 = arith.divf %115, %116 : vector<2x50xf32>
    %c6_44 = arith.constant 6 : index
    %c256_45 = arith.constant 256 : index
    %118 = vector.load %arg15[%c6_44, %c256_45] : memref<16x384xf32, #tpu.memory_space<vmem>>, vector<2x50xf32>
    %119 = vector.extract_strided_slice %101 {offsets = [0, 256], sizes = [2, 50], strides = [1, 1]} : vector<2x384xf32> to vector<2x50xf32>
    %120 = vector.broadcast %8 : vector<1x50xf32> to vector<2x50xf32>
    %121 = arith.addf %119, %120 : vector<2x50xf32>
    %122 = arith.mulf %109, %121 : vector<2x50xf32>
    %123 = arith.addf %118, %122 : vector<2x50xf32>
    %124 = math.tanh %123 : vector<2x50xf32>
    %cst_46 = arith.constant 1.000000e+00 : f32
    %125 = vector.broadcast %cst_46 : f32 to vector<2x50xf32>
    %126 = arith.subf %125, %117 : vector<2x50xf32>
    %127 = arith.mulf %126, %124 : vector<2x50xf32>
    %128 = arith.mulf %117, %99 : vector<2x50xf32>
    %129 = arith.addf %127, %128 : vector<2x50xf32>
    %130 = arith.truncf %129 : vector<2x50xf32> to vector<2x50xbf16>
    %cst_47 = arith.constant dense<0.000000e+00> : vector<2x384xf32>
    %131 = tpu.matmul %130, %7, %cst_47 {dimension_numbers = #tpu.dot_dimension_numbers<[1], [0], [0], [1], [0, 0, 1, 1], [], []>} : vector<2x50xbf16>, vector<50x384xbf16>, vector<2x384xf32> -> vector<2x384xf32>
    %c8 = arith.constant 8 : index
    %c0_48 = arith.constant 0 : index
    %132 = vector.load %arg15[%c8, %c0_48] : memref<16x384xf32, #tpu.memory_space<vmem>>, vector<2x50xf32>
    %133 = vector.extract_strided_slice %131 {offsets = [0, 0], sizes = [2, 50], strides = [1, 1]} : vector<2x384xf32> to vector<2x50xf32>
    %134 = arith.addf %132, %133 : vector<2x50xf32>
    %135 = arith.negf %134 : vector<2x50xf32>
    %136 = math.exp %135 : vector<2x50xf32>
    %cst_49 = arith.constant 1.000000e+00 : f32
    %137 = vector.broadcast %cst_49 : f32 to vector<2x50xf32>
    %138 = arith.addf %137, %136 : vector<2x50xf32>
    %139 = arith.divf %137, %138 : vector<2x50xf32>
    %c8_50 = arith.constant 8 : index
    %c128_51 = arith.constant 128 : index
    %140 = vector.load %arg15[%c8_50, %c128_51] : memref<16x384xf32, #tpu.memory_space<vmem>>, vector<2x50xf32>
    %141 = vector.extract_strided_slice %131 {offsets = [0, 128], sizes = [2, 50], strides = [1, 1]} : vector<2x384xf32> to vector<2x50xf32>
    %142 = arith.addf %140, %141 : vector<2x50xf32>
    %143 = arith.negf %142 : vector<2x50xf32>
    %144 = math.exp %143 : vector<2x50xf32>
    %cst_52 = arith.constant 1.000000e+00 : f32
    %145 = vector.broadcast %cst_52 : f32 to vector<2x50xf32>
    %146 = arith.addf %145, %144 : vector<2x50xf32>
    %147 = arith.divf %145, %146 : vector<2x50xf32>
    %c8_53 = arith.constant 8 : index
    %c256_54 = arith.constant 256 : index
    %148 = vector.load %arg15[%c8_53, %c256_54] : memref<16x384xf32, #tpu.memory_space<vmem>>, vector<2x50xf32>
    %149 = vector.extract_strided_slice %131 {offsets = [0, 256], sizes = [2, 50], strides = [1, 1]} : vector<2x384xf32> to vector<2x50xf32>
    %150 = vector.broadcast %8 : vector<1x50xf32> to vector<2x50xf32>
    %151 = arith.addf %149, %150 : vector<2x50xf32>
    %152 = arith.mulf %139, %151 : vector<2x50xf32>
    %153 = arith.addf %148, %152 : vector<2x50xf32>
    %154 = math.tanh %153 : vector<2x50xf32>
    %cst_55 = arith.constant 1.000000e+00 : f32
    %155 = vector.broadcast %cst_55 : f32 to vector<2x50xf32>
    %156 = arith.subf %155, %147 : vector<2x50xf32>
    %157 = arith.mulf %156, %154 : vector<2x50xf32>
    %158 = arith.mulf %147, %129 : vector<2x50xf32>
    %159 = arith.addf %157, %158 : vector<2x50xf32>
    %160 = arith.truncf %159 : vector<2x50xf32> to vector<2x50xbf16>
    %cst_56 = arith.constant dense<0.000000e+00> : vector<2x384xf32>
    %161 = tpu.matmul %160, %7, %cst_56 {dimension_numbers = #tpu.dot_dimension_numbers<[1], [0], [0], [1], [0, 0, 1, 1], [], []>} : vector<2x50xbf16>, vector<50x384xbf16>, vector<2x384xf32> -> vector<2x384xf32>
    %c10 = arith.constant 10 : index
    %c0_57 = arith.constant 0 : index
    %162 = vector.load %arg15[%c10, %c0_57] : memref<16x384xf32, #tpu.memory_space<vmem>>, vector<2x50xf32>
    %163 = vector.extract_strided_slice %161 {offsets = [0, 0], sizes = [2, 50], strides = [1, 1]} : vector<2x384xf32> to vector<2x50xf32>
    %164 = arith.addf %162, %163 : vector<2x50xf32>
    %165 = arith.negf %164 : vector<2x50xf32>
    %166 = math.exp %165 : vector<2x50xf32>
    %cst_58 = arith.constant 1.000000e+00 : f32
    %167 = vector.broadcast %cst_58 : f32 to vector<2x50xf32>
    %168 = arith.addf %167, %166 : vector<2x50xf32>
    %169 = arith.divf %167, %168 : vector<2x50xf32>
    %c10_59 = arith.constant 10 : index
    %c128_60 = arith.constant 128 : index
    %170 = vector.load %arg15[%c10_59, %c128_60] : memref<16x384xf32, #tpu.memory_space<vmem>>, vector<2x50xf32>
    %171 = vector.extract_strided_slice %161 {offsets = [0, 128], sizes = [2, 50], strides = [1, 1]} : vector<2x384xf32> to vector<2x50xf32>
    %172 = arith.addf %170, %171 : vector<2x50xf32>
    %173 = arith.negf %172 : vector<2x50xf32>
    %174 = math.exp %173 : vector<2x50xf32>
    %cst_61 = arith.constant 1.000000e+00 : f32
    %175 = vector.broadcast %cst_61 : f32 to vector<2x50xf32>
    %176 = arith.addf %175, %174 : vector<2x50xf32>
    %177 = arith.divf %175, %176 : vector<2x50xf32>
    %c10_62 = arith.constant 10 : index
    %c256_63 = arith.constant 256 : index
    %178 = vector.load %arg15[%c10_62, %c256_63] : memref<16x384xf32, #tpu.memory_space<vmem>>, vector<2x50xf32>
    %179 = vector.extract_strided_slice %161 {offsets = [0, 256], sizes = [2, 50], strides = [1, 1]} : vector<2x384xf32> to vector<2x50xf32>
    %180 = vector.broadcast %8 : vector<1x50xf32> to vector<2x50xf32>
    %181 = arith.addf %179, %180 : vector<2x50xf32>
    %182 = arith.mulf %169, %181 : vector<2x50xf32>
    %183 = arith.addf %178, %182 : vector<2x50xf32>
    %184 = math.tanh %183 : vector<2x50xf32>
    %cst_64 = arith.constant 1.000000e+00 : f32
    %185 = vector.broadcast %cst_64 : f32 to vector<2x50xf32>
    %186 = arith.subf %185, %177 : vector<2x50xf32>
    %187 = arith.mulf %186, %184 : vector<2x50xf32>
    %188 = arith.mulf %177, %159 : vector<2x50xf32>
    %189 = arith.addf %187, %188 : vector<2x50xf32>
    %190 = arith.truncf %189 : vector<2x50xf32> to vector<2x50xbf16>
    %cst_65 = arith.constant dense<0.000000e+00> : vector<2x384xf32>
    %191 = tpu.matmul %190, %7, %cst_65 {dimension_numbers = #tpu.dot_dimension_numbers<[1], [0], [0], [1], [0, 0, 1, 1], [], []>} : vector<2x50xbf16>, vector<50x384xbf16>, vector<2x384xf32> -> vector<2x384xf32>
    %c12 = arith.constant 12 : index
    %c0_66 = arith.constant 0 : index
    %192 = vector.load %arg15[%c12, %c0_66] : memref<16x384xf32, #tpu.memory_space<vmem>>, vector<2x50xf32>
    %193 = vector.extract_strided_slice %191 {offsets = [0, 0], sizes = [2, 50], strides = [1, 1]} : vector<2x384xf32> to vector<2x50xf32>
    %194 = arith.addf %192, %193 : vector<2x50xf32>
    %195 = arith.negf %194 : vector<2x50xf32>
    %196 = math.exp %195 : vector<2x50xf32>
    %cst_67 = arith.constant 1.000000e+00 : f32
    %197 = vector.broadcast %cst_67 : f32 to vector<2x50xf32>
    %198 = arith.addf %197, %196 : vector<2x50xf32>
    %199 = arith.divf %197, %198 : vector<2x50xf32>
    %c12_68 = arith.constant 12 : index
    %c128_69 = arith.constant 128 : index
    %200 = vector.load %arg15[%c12_68, %c128_69] : memref<16x384xf32, #tpu.memory_space<vmem>>, vector<2x50xf32>
    %201 = vector.extract_strided_slice %191 {offsets = [0, 128], sizes = [2, 50], strides = [1, 1]} : vector<2x384xf32> to vector<2x50xf32>
    %202 = arith.addf %200, %201 : vector<2x50xf32>
    %203 = arith.negf %202 : vector<2x50xf32>
    %204 = math.exp %203 : vector<2x50xf32>
    %cst_70 = arith.constant 1.000000e+00 : f32
    %205 = vector.broadcast %cst_70 : f32 to vector<2x50xf32>
    %206 = arith.addf %205, %204 : vector<2x50xf32>
    %207 = arith.divf %205, %206 : vector<2x50xf32>
    %c12_71 = arith.constant 12 : index
    %c256_72 = arith.constant 256 : index
    %208 = vector.load %arg15[%c12_71, %c256_72] : memref<16x384xf32, #tpu.memory_space<vmem>>, vector<2x50xf32>
    %209 = vector.extract_strided_slice %191 {offsets = [0, 256], sizes = [2, 50], strides = [1, 1]} : vector<2x384xf32> to vector<2x50xf32>
    %210 = vector.broadcast %8 : vector<1x50xf32> to vector<2x50xf32>
    %211 = arith.addf %209, %210 : vector<2x50xf32>
    %212 = arith.mulf %199, %211 : vector<2x50xf32>
    %213 = arith.addf %208, %212 : vector<2x50xf32>
    %214 = math.tanh %213 : vector<2x50xf32>
    %cst_73 = arith.constant 1.000000e+00 : f32
    %215 = vector.broadcast %cst_73 : f32 to vector<2x50xf32>
    %216 = arith.subf %215, %207 : vector<2x50xf32>
    %217 = arith.mulf %216, %214 : vector<2x50xf32>
    %218 = arith.mulf %207, %189 : vector<2x50xf32>
    %219 = arith.addf %217, %218 : vector<2x50xf32>
    %220 = arith.truncf %219 : vector<2x50xf32> to vector<2x50xbf16>
    %cst_74 = arith.constant dense<0.000000e+00> : vector<2x384xf32>
    %221 = tpu.matmul %220, %7, %cst_74 {dimension_numbers = #tpu.dot_dimension_numbers<[1], [0], [0], [1], [0, 0, 1, 1], [], []>} : vector<2x50xbf16>, vector<50x384xbf16>, vector<2x384xf32> -> vector<2x384xf32>
    %c14 = arith.constant 14 : index
    %c0_75 = arith.constant 0 : index
    %222 = vector.load %arg15[%c14, %c0_75] : memref<16x384xf32, #tpu.memory_space<vmem>>, vector<2x50xf32>
    %223 = vector.extract_strided_slice %221 {offsets = [0, 0], sizes = [2, 50], strides = [1, 1]} : vector<2x384xf32> to vector<2x50xf32>
    %224 = arith.addf %222, %223 : vector<2x50xf32>
    %225 = arith.negf %224 : vector<2x50xf32>
    %226 = math.exp %225 : vector<2x50xf32>
    %cst_76 = arith.constant 1.000000e+00 : f32
    %227 = vector.broadcast %cst_76 : f32 to vector<2x50xf32>
    %228 = arith.addf %227, %226 : vector<2x50xf32>
    %229 = arith.divf %227, %228 : vector<2x50xf32>
    %c14_77 = arith.constant 14 : index
    %c128_78 = arith.constant 128 : index
    %230 = vector.load %arg15[%c14_77, %c128_78] : memref<16x384xf32, #tpu.memory_space<vmem>>, vector<2x50xf32>
    %231 = vector.extract_strided_slice %221 {offsets = [0, 128], sizes = [2, 50], strides = [1, 1]} : vector<2x384xf32> to vector<2x50xf32>
    %232 = arith.addf %230, %231 : vector<2x50xf32>
    %233 = arith.negf %232 : vector<2x50xf32>
    %234 = math.exp %233 : vector<2x50xf32>
    %cst_79 = arith.constant 1.000000e+00 : f32
    %235 = vector.broadcast %cst_79 : f32 to vector<2x50xf32>
    %236 = arith.addf %235, %234 : vector<2x50xf32>
    %237 = arith.divf %235, %236 : vector<2x50xf32>
    %c14_80 = arith.constant 14 : index
    %c256_81 = arith.constant 256 : index
    %238 = vector.load %arg15[%c14_80, %c256_81] : memref<16x384xf32, #tpu.memory_space<vmem>>, vector<2x50xf32>
    %239 = vector.extract_strided_slice %221 {offsets = [0, 256], sizes = [2, 50], strides = [1, 1]} : vector<2x384xf32> to vector<2x50xf32>
    %240 = vector.broadcast %8 : vector<1x50xf32> to vector<2x50xf32>
    %241 = arith.addf %239, %240 : vector<2x50xf32>
    %242 = arith.mulf %229, %241 : vector<2x50xf32>
    %243 = arith.addf %238, %242 : vector<2x50xf32>
    %244 = math.tanh %243 : vector<2x50xf32>
    %cst_82 = arith.constant 1.000000e+00 : f32
    %245 = vector.broadcast %cst_82 : f32 to vector<2x50xf32>
    %246 = arith.subf %245, %237 : vector<2x50xf32>
    %247 = arith.mulf %246, %244 : vector<2x50xf32>
    %248 = arith.mulf %237, %219 : vector<2x50xf32>
    %249 = arith.addf %247, %248 : vector<2x50xf32>
    %250 = arith.truncf %249 : vector<2x50xf32> to vector<2x50xbf16>
    %c0_83 = arith.constant 0 : index
    %c0_84 = arith.constant 0 : index
    %251 = vector.load %arg7[%c0_83, %c0_84] : memref<50x50xbf16, #tpu.memory_space<vmem>>, vector<50x50xbf16>
    %cst_85 = arith.constant dense<0.000000e+00> : vector<2x50xf32>
    %252 = tpu.matmul %250, %251, %cst_85 {dimension_numbers = #tpu.dot_dimension_numbers<[1], [0], [0], [1], [0, 0, 1, 1], [], []>} : vector<2x50xbf16>, vector<50x50xbf16>, vector<2x50xf32> -> vector<2x50xf32>
    %c0_86 = arith.constant 0 : index
    %c0_87 = arith.constant 0 : index
    %253 = vector.load %arg8[%c0_86, %c0_87] : memref<1x50xf32, #tpu.memory_space<vmem>>, vector<1x50xf32>
    %254 = vector.broadcast %253 : vector<1x50xf32> to vector<2x50xf32>
    %255 = arith.addf %252, %254 : vector<2x50xf32>
    %cst_88 = arith.constant 0.000000e+00 : f32
    %256 = vector.broadcast %cst_88 : f32 to vector<2x50xf32>
    %257 = arith.maximumf %255, %256 : vector<2x50xf32>
    %258 = arith.truncf %257 : vector<2x50xf32> to vector<2x50xbf16>
    %c0_89 = arith.constant 0 : index
    %c0_90 = arith.constant 0 : index
    %259 = vector.load %arg9[%c0_89, %c0_90] : memref<50x50xbf16, #tpu.memory_space<vmem>>, vector<50x50xbf16>
    %cst_91 = arith.constant dense<0.000000e+00> : vector<2x50xf32>
    %260 = tpu.matmul %258, %259, %cst_91 {dimension_numbers = #tpu.dot_dimension_numbers<[1], [0], [0], [1], [0, 0, 1, 1], [], []>} : vector<2x50xbf16>, vector<50x50xbf16>, vector<2x50xf32> -> vector<2x50xf32>
    %c0_92 = arith.constant 0 : index
    %c0_93 = arith.constant 0 : index
    %261 = vector.load %arg11[%c0_92, %c0_93] : memref<1x50xf32, #tpu.memory_space<vmem>>, vector<1x50xf32>
    %262 = vector.broadcast %261 : vector<1x50xf32> to vector<2x50xf32>
    %263 = arith.addf %260, %262 : vector<2x50xf32>
    %c0_94 = arith.constant 0 : index
    %c0_95 = arith.constant 0 : index
    %264 = vector.load %arg10[%c0_94, %c0_95] : memref<16x50xbf16, #tpu.memory_space<vmem>>, vector<16x50xbf16>
    %c0_96 = arith.constant 0 : index
    %c0_97 = arith.constant 0 : index
    %265 = vector.load %arg12[%c0_96, %c0_97] : memref<1x50xf32, #tpu.memory_space<vmem>>, vector<1x50xf32>
    %c0_98 = arith.constant 0 : index
    %c0_99 = arith.constant 0 : index
    %c0_100 = arith.constant 0 : index
    %266 = vector.load %arg2[%c0_98, %c0_99, %c0_100] : memref<2x6x16xbf16, #tpu.memory_space<vmem>>, vector<1x6x16xbf16>
    %267 = vector.shape_cast %266 : vector<1x6x16xbf16> to vector<6x16xbf16>
    %cst_101 = arith.constant dense<0.000000e+00> : vector<6x50xf32>
    %268 = tpu.matmul %267, %264, %cst_101 {dimension_numbers = #tpu.dot_dimension_numbers<[1], [0], [0], [1], [0, 0, 1, 1], [], []>} : vector<6x16xbf16>, vector<16x50xbf16>, vector<6x50xf32> -> vector<6x50xf32>
    %269 = vector.extract_strided_slice %263 {offsets = [0, 0], sizes = [1, 50], strides = [1, 1]} : vector<2x50xf32> to vector<1x50xf32>
    %270 = vector.broadcast %269 : vector<1x50xf32> to vector<6x50xf32>
    %271 = arith.addf %268, %270 : vector<6x50xf32>
    %cst_102 = arith.constant 0.000000e+00 : f32
    %272 = vector.broadcast %cst_102 : f32 to vector<6x50xf32>
    %273 = arith.maximumf %271, %272 : vector<6x50xf32>
    %274 = vector.broadcast %265 : vector<1x50xf32> to vector<6x50xf32>
    %275 = arith.mulf %273, %274 : vector<6x50xf32>
    %cst_103 = arith.constant dense<0.000000e+00> : vector<6xf32>
    %276 = vector.multi_reduction <add>, %275, %cst_103 [1] : vector<6x50xf32> to vector<6xf32>
    %277 = vector.shape_cast %276 : vector<6xf32> to vector<1x6xf32>
    %c0_104 = arith.constant 0 : index
    %c0_105 = arith.constant 0 : index
    %278 = vector.load %arg13[%c0_104, %c0_105] : memref<1x1xf32, #tpu.memory_space<vmem>>, vector<1x1xf32>
    %279 = vector.broadcast %278 : vector<1x1xf32> to vector<1x6xf32>
    %280 = arith.addf %277, %279 : vector<1x6xf32>
    %c0_106 = arith.constant 0 : index
    %c0_107 = arith.constant 0 : index
    %281 = vector.load %arg14[%c0_106, %c0_107] : memref<2x6xf32, #tpu.memory_space<vmem>>, vector<1x6xf32>
    tpu.vector_store %arg14[%c0_106, %c0_107], %280 {strides = array<i32>} : memref<2x6xf32, #tpu.memory_space<vmem>>, vector<1x6xf32>,
    %c1 = arith.constant 1 : index
    %c0_108 = arith.constant 0 : index
    %c0_109 = arith.constant 0 : index
    %282 = vector.load %arg2[%c1, %c0_108, %c0_109] : memref<2x6x16xbf16, #tpu.memory_space<vmem>>, vector<1x6x16xbf16>
    %283 = vector.shape_cast %282 : vector<1x6x16xbf16> to vector<6x16xbf16>
    %cst_110 = arith.constant dense<0.000000e+00> : vector<6x50xf32>
    %284 = tpu.matmul %283, %264, %cst_110 {dimension_numbers = #tpu.dot_dimension_numbers<[1], [0], [0], [1], [0, 0, 1, 1], [], []>} : vector<6x16xbf16>, vector<16x50xbf16>, vector<6x50xf32> -> vector<6x50xf32>
    %285 = vector.extract_strided_slice %263 {offsets = [1, 0], sizes = [1, 50], strides = [1, 1]} : vector<2x50xf32> to vector<1x50xf32>
    %286 = vector.broadcast %285 : vector<1x50xf32> to vector<6x50xf32>
    %287 = arith.addf %284, %286 : vector<6x50xf32>
    %cst_111 = arith.constant 0.000000e+00 : f32
    %288 = vector.broadcast %cst_111 : f32 to vector<6x50xf32>
    %289 = arith.maximumf %287, %288 : vector<6x50xf32>
    %290 = vector.broadcast %265 : vector<1x50xf32> to vector<6x50xf32>
    %291 = arith.mulf %289, %290 : vector<6x50xf32>
    %cst_112 = arith.constant dense<0.000000e+00> : vector<6xf32>
    %292 = vector.multi_reduction <add>, %291, %cst_112 [1] : vector<6x50xf32> to vector<6xf32>
    %293 = vector.shape_cast %292 : vector<6xf32> to vector<1x6xf32>
    %c0_113 = arith.constant 0 : index
    %c0_114 = arith.constant 0 : index
    %294 = vector.load %arg13[%c0_113, %c0_114] : memref<1x1xf32, #tpu.memory_space<vmem>>, vector<1x1xf32>
    %295 = vector.broadcast %294 : vector<1x1xf32> to vector<1x6xf32>
    %296 = arith.addf %293, %295 : vector<1x6xf32>
    %c1_115 = arith.constant 1 : index
    %c0_116 = arith.constant 0 : index
    %297 = vector.load %arg14[%c1_115, %c0_116] : memref<2x6xf32, #tpu.memory_space<vmem>>, vector<1x6xf32>
    tpu.vector_store %arg14[%c1_115, %c0_116], %296 {strides = array<i32>} : memref<2x6xf32, #tpu.memory_space<vmem>>, vector<1x6xf32>,
    return
  }
  func.func @transform_0(%arg0: i32) -> (i32, i32) {
    %c0_i32 = arith.constant 0 : i32
    %c0_i32_0 = arith.constant 0 : i32
    %c0_i32_1 = arith.constant 0 : i32
    return %c0_i32, %c0_i32_0 : i32, i32
  }
  func.func @transform_1(%arg0: i32) -> (i32, i32, i32) {
    %c0_i32 = arith.constant 0 : i32
    %c0_i32_0 = arith.constant 0 : i32
    %c0_i32_1 = arith.constant 0 : i32
    %c0_i32_2 = arith.constant 0 : i32
    return %c0_i32, %c0_i32_0, %c0_i32_1 : i32, i32, i32
  }
  func.func @transform_2(%arg0: i32) -> (i32, i32) {
    %c0_i32 = arith.constant 0 : i32
    %c0_i32_0 = arith.constant 0 : i32
    %c0_i32_1 = arith.constant 0 : i32
    return %c0_i32, %c0_i32_0 : i32, i32
  }
  func.func @transform_3(%arg0: i32) -> (i32, i32) {
    %c0_i32 = arith.constant 0 : i32
    %c0_i32_0 = arith.constant 0 : i32
    %c0_i32_1 = arith.constant 0 : i32
    return %c0_i32, %c0_i32_0 : i32, i32
  }
  func.func @transform_4(%arg0: i32) -> (i32, i32) {
    %c0_i32 = arith.constant 0 : i32
    %c0_i32_0 = arith.constant 0 : i32
    %c0_i32_1 = arith.constant 0 : i32
    return %c0_i32, %c0_i32_0 : i32, i32
  }
  func.func @transform_5(%arg0: i32) -> (i32, i32) {
    %c0_i32 = arith.constant 0 : i32
    %c0_i32_0 = arith.constant 0 : i32
    %c0_i32_1 = arith.constant 0 : i32
    return %c0_i32, %c0_i32_0 : i32, i32
  }
  func.func @transform_6(%arg0: i32) -> (i32, i32) {
    %c0_i32 = arith.constant 0 : i32
    %c0_i32_0 = arith.constant 0 : i32
    %c0_i32_1 = arith.constant 0 : i32
    return %c0_i32, %c0_i32_0 : i32, i32
  }
  func.func @transform_7(%arg0: i32) -> (i32, i32) {
    %c0_i32 = arith.constant 0 : i32
    %c0_i32_0 = arith.constant 0 : i32
    %c0_i32_1 = arith.constant 0 : i32
    return %c0_i32, %c0_i32_0 : i32, i32
  }
  func.func @transform_8(%arg0: i32) -> (i32, i32) {
    %c0_i32 = arith.constant 0 : i32
    %c0_i32_0 = arith.constant 0 : i32
    %c0_i32_1 = arith.constant 0 : i32
    return %c0_i32, %c0_i32_0 : i32, i32
  }
  func.func @transform_9(%arg0: i32) -> (i32, i32) {
    %c0_i32 = arith.constant 0 : i32
    %c0_i32_0 = arith.constant 0 : i32
    %c0_i32_1 = arith.constant 0 : i32
    return %c0_i32, %c0_i32_0 : i32, i32
  }
  func.func @transform_10(%arg0: i32) -> (i32, i32) {
    %c0_i32 = arith.constant 0 : i32
    %c0_i32_0 = arith.constant 0 : i32
    %c0_i32_1 = arith.constant 0 : i32
    return %c0_i32, %c0_i32_0 : i32, i32
  }
  func.func @transform_11(%arg0: i32) -> (i32, i32) {
    %c0_i32 = arith.constant 0 : i32
    %c0_i32_0 = arith.constant 0 : i32
    %c0_i32_1 = arith.constant 0 : i32
    return %c0_i32, %c0_i32_0 : i32, i32
  }
  func.func @transform_12(%arg0: i32) -> (i32, i32) {
    %c0_i32 = arith.constant 0 : i32
    %c0_i32_0 = arith.constant 0 : i32
    %c0_i32_1 = arith.constant 0 : i32
    return %c0_i32, %c0_i32_0 : i32, i32
  }
  func.func @transform_13(%arg0: i32) -> (i32, i32) {
    %c0_i32 = arith.constant 0 : i32
    %c0_i32_0 = arith.constant 0 : i32
    %c0_i32_1 = arith.constant 0 : i32
    return %c0_i32, %c0_i32_0 : i32, i32
  }
}

</mosaic_0001>

<bundles_post_ra>
// kernel: actor_b_forward.1
= control target key start
LH: loop header
LB: loop body
LE: loop exit
PB: predicated region body
PF: predicated region fallthrough
CT: control target
= control target key end

     0   :  { %s2549_s0 = inlined_call_operand.vmem [shape: bf16[16,50], index: 0, kind: input, shape index: {}]   ;;  %s2550_s1 = inlined_call_operand.vmem [shape: bf16[2,6,16], index: 1, kind: input, shape index: {}]   ;;  %s2551_s2 = inlined_call_operand.vmem [shape: bf16[50,384], index: 2, kind: input, shape index: {}]   ;;  %s2552_s3 = inlined_call_operand.vmem [shape: bf16[50,384], index: 3, kind: input, shape index: {}]   ;;  %s2553_s4 = inlined_call_operand.vmem [shape: f32[1,384], index: 4, kind: input, shape index: {}]   ;;  %s2554_s5 = inlined_call_operand.vmem [shape: f32[1,50], index: 5, kind: input, shape index: {}]   ;;  %s2555_s6 = inlined_call_operand.vmem [shape: bf16[50,50], index: 6, kind: input, shape index: {}]   ;;  %s2556_s7 = inlined_call_operand.vmem [shape: f32[1,50], index: 7, kind: input, shape index: {}]   ;;  %s2557_s8 = inlined_call_operand.vmem [shape: bf16[50,50], index: 8, kind: input, shape index: {}]   ;;  %s2558_s9 = inlined_call_operand.vmem [shape: bf16[16,50], index: 9, kind: input, shape index: {}]   ;;  %s2559_s10 = inlined_call_operand.vmem [shape: f32[1,50], index: 10, kind: input, shape index: {}]   ;;  %s2560_s11 = inlined_call_operand.vmem [shape: f32[1,50], index: 11, kind: input, shape index: {}]   ;;  %s2561_s12 = inlined_call_operand.<no memory space> [shape: f32[1,1], index: 12, kind: input, shape index: {}]   ;;  %s2562_s13 = inlined_call_operand.hbm [shape: f32[2,6], index: 13, kind: output, shape index: {}]  }
   0x1   :  { %v18_v0 = vstv %s2561_s12 }
   0x2   :  { %19 = vst [vmem:[#allocation3] sm:$0x1] %v18_v0 }
   0x3   :  { %v1933_v1 = vld [vmem:[%s2551_s2 + $0x4] ss:$12 sps:$4 sm:$0xff]   ;;  %v1935_v2 = vld [vmem:[%s2551_s2] ss:$12 sps:$4 sm:$0xff]   ;;  %v2077_v3 = vmov 0   ;;  %v2078_v5 = vmov 0.0  }
   0x4   :  { %188 = vmatprep.mubr.bf16.mxu0 %v2077_v3  ;;  %1931 = vset.pattern.permute.xlu1 %v2077_v3  ;;  %v1936_v4 = vld [vmem:[%s2551_s2 + $0x1c] ss:$12 sps:$4 sm:$0xff]   ;;  %v1938_v6 = vld [vmem:[%s2551_s2 + $0x18] ss:$12 sps:$4 sm:$0xff]   ;;  %vm2079_vm0 = vmmov 0   ;;  %vm146_vm1 = vcmask 1040384  }
   0x5   :  { %156 = vmatprep.subr.bf16.mxu0 %v1933_v1  ;;  %1783 = vmatprep.subr.bf16.mxu1 %v2078_v5  ;;  %v1939_v7 = vld [vmem:[%s2551_s2 + $0x34] ss:$12 sps:$4 sm:$0xff]   ;;  %v62_v8 = vld [vmem:[%s2551_s2 + $0x48] sm:$0x11]  ;;  %v1941_v9 = vld [vmem:[%s2551_s2 + $0x30] ss:$12 sps:$4 sm:$0xff]  }
   0x6   :  { %157 = vmatpush1.bf16.msra.mxu0 %v1935_v2  ;;  %1791 = vmatprep.mubr.msk.bf16.mxu1 %vm2079_vm0, %v2078_v5  ;;  %v1651_v10 = vcombine.high %v62_v8, %v62_v8  ;;  %v1650_v11 = vcombine.low %v62_v8, %v62_v8  ;;  %v1951_v12 = vld [vmem:[%s2551_s2 + $0x8] ss:$12 sps:$4 sm:$0xff]   ;;  %v2187_v13 = vld [vmem:[%s2552_s3 + $0x4] ss:$12 sps:$4 sm:$0xff]   ;;  %v1955_v14 = vld [vmem:[%s2551_s2 + $0x20] ss:$12 sps:$4 sm:$0xff]  }
   0x7   :  { %158 = vmatprep.subr.bf16.mxu0 %v1936_v4  ;;  %1932 = vset.pattern.permute.xlu0 %v2077_v3  ;;  %vm142_vm2 = vcmask 408576   ;;  %v1958_v16 = vld [vmem:[%s2551_s2 + $0x38] ss:$12 sps:$4 sm:$0xff]   ;;  %v1959_v18 = vld [vmem:[%s2551_s2 + $0x50] ss:$0 sps:$4 sm:$0x11]  }
   0x8   :  { %1784 = vmatpush3.bf16.msra.mxu1 %v1951_v12  ;;  %v148_v15 = vsel %vm146_vm1, %v1650_v11, 0  ;;  %v1944_v17 = vld [vmem:[%s2549_s0] sm:$0xff]   ;;  %v2214_v20 = vld [vmem:[%s2552_s3 + $0x1c] ss:$12 sps:$4 sm:$0xff]   ;;  %v154_v23 = vsel %vm146_vm1, %v1959_v18, 0 }
   0x9   :  { %1785 = vmatprep.subr.bf16.mxu1 %v2078_v5  ;;  %v2207_v19 = vld [vmem:[%s2552_s3] ss:$12 sps:$4 sm:$0xff]   ;;  %v2219_v21 = vld [vmem:[%s2552_s3 + $0x18] ss:$12 sps:$4 sm:$0xff]   ;;  %v2238_v25 = vld [vmem:[%s2552_s3 + $0x8] ss:$12 sps:$4 sm:$0xff]  }
   0xa   :  { %159 = vmatpush1.bf16.msra.mxu0 %v1938_v6  ;;  %v2225_v22 = vld [vmem:[%s2552_s3 + $0x34] ss:$12 sps:$4 sm:$0xff]   ;;  %v258_v24 = vld [vmem:[%s2552_s3 + $0x48] sm:$0x11]  ;;  %v2243_v26 = vld [vmem:[%s2552_s3 + $0x30] ss:$12 sps:$4 sm:$0xff]  }
   0xb   :  { %160 = vmatprep.subr.bf16.mxu0 %v1939_v7  ;;  %v2248_v27 = vcombine.high %v258_v24, %v258_v24  ;;  %v1665_v28 = vcombine.low %v258_v24, %v258_v24 }
   0xc   :  { %1786 = vmatpush3.bf16.msra.mxu1 %v1955_v14 }
   0xd   :  { %1787 = vmatprep.subr.bf16.mxu1 %v2078_v5 }
   0xe   :  { %161 = vmatpush1.bf16.msra.mxu0 %v1941_v9 }
   0xf   :  { %1653 = vmatprep.subr.msk.bf16.mxu0 %vm146_vm1, %v1651_v10 }
  0x10   :  { %1788 = vmatpush3.bf16.msra.mxu1 %v1958_v16 }
  0x11   :  { %1789 = vmatprep.subr.bf16.mxu1 %v2078_v5 }
  0x12   :  { %163 = vmatpush1.bf16.msra.mxu0 %v148_v15 }
  0x13   :  { %329 = vmatprep.subr.bf16.mxu0 %v2187_v13 }
  0x14   :  { %1790 = vmatpush3.bf16.msra.mxu1 %v154_v23 }
  0x15   :  { %1654 = vmatmul.mubr.msk.bf16.vlgmr.msra.gmra.mrb[0].mxu0 %vm142_vm2, %v1944_v17  ;;  %1795 = vmatprep.subr.bf16.mxu1 %v2078_v5 }
  0x16   :  { %330 = vmatpush1.bf16.msra.mxu0 %v2207_v19  ;;  %361 = vmatprep.mubr.bf16.mxu0 %v2077_v3 }
  0x17   :  { %331 = vmatprep.subr.bf16.mxu0 %v2214_v20 }
  0x1a   :  { %332 = vmatpush1.bf16.msra.mxu0 %v2219_v21 }
  0x1b   :  { %333 = vmatprep.subr.bf16.mxu0 %v2225_v22 }
  0x1c   :  { %20 = vsyncpa [#allocation5], 0  ;;  %1792 = vmatmul.mubr.msk.bf16.vlgmr.msra.gmra.mrb[0].mxu1 %vm142_vm2, %v1944_v17  ;;  %v2255_v29 = vld [vmem:[%s2552_s3 + $0x20] ss:$12 sps:$4 sm:$0xff]   ;;  %v2264_v30 = vsel %vm146_vm1, %v1665_v28, 0  ;;  %v66_v34 = vlaneseq  ;;  %vm1477_vm3 = vcmask 130048  }
  0x1d   :  { %1796 = vmatpush3.bf16.msra.mxu1 %v2238_v25  ;;  %1803 = vmatprep.mubr.msk.bf16.mxu1 %vm2079_vm0, %v2078_v5  ;;  %v2270_v31 = vld [vmem:[%s2552_s3 + $0x38] ss:$12 sps:$4 sm:$0xff]   ;;  %v1963_v32 = vld [vmem:[%s2552_s3 + $0x50] ss:$0 sps:$4 sm:$0x11]   ;;  %vm1529_vm4 = vcmask 406528  }
  0x1e   :  { %334 = vmatpush1.bf16.msra.mxu0 %v2243_v26  ;;  %1797 = vmatprep.subr.bf16.mxu1 %v2078_v5  ;;  %v2282_v33 = vsel %vm146_vm1, %v1963_v32, 0  ;;  %v2308_v35 = vshrl.u32 %v66_v34, 7  ;;  %v64_v37 = vld [vmem:[%s2553_s4] sm:$0x7]  ;;  %vm1552_vm5 = vcmask 40960  }
  0x1f   :  { %1668 = vmatprep.subr.msk.bf16.mxu0 %vm146_vm1, %v2248_v27  ;;  %v2324_v12 = vld [vmem:[%s2554_s5] ss:$0 sm:$0xff] }
  0x20   :  { %v2311_v36 = vsub.s32 0, %v2308_v35  ;;  %v72_v38 = vsub.s32 1, %v2308_v35  ;;  %v76_v42 = vsub.s32 2, %v2308_v35 }
  0x21   :  { %1798 = vmatpush3.bf16.msra.mxu1 %v2255_v29 }
  0x22   :  { %336 = vmatpush1.bf16.msra.mxu0 %v2264_v30  ;;  %1799 = vmatprep.subr.bf16.mxu1 %v2078_v5  ;;  %v69_v39 = vrot.slane %v64_v37, %v2311_v36  ;;  %v73_v40 = vrot.slane %v64_v37, %v72_v38  ;;  %v77_v50 = vrot.slane %v64_v37, %v76_v42 }
  0x23   :  { %445 = vmatprep.subr.bf16.mxu0 %v2187_v13 }
  0x25   :  { %362 = vmatmul.mubr.bf16.vlgmr.msra.gmra.mrb[4].mxu0 %v2077_v3  ;;  %1800 = vmatpush3.bf16.msra.mxu1 %v2270_v31 }
  0x26   :  { %1801 = vmatprep.subr.bf16.mxu1 %v2078_v5  ;;  %446 = vmatpush1.bf16.msra.mxu0 %v2207_v19 }
  0x27   :  { %447 = vmatprep.subr.bf16.mxu0 %v2214_v20  ;;  %477 = vmatprep.mubr.bf16.mxu0 %v2077_v3 }
  0x29   :  { %1802 = vmatpush3.bf16.msra.mxu1 %v2282_v33 }
  0x2a   :  { %1807 = vmatprep.subr.bf16.mxu1 %v2078_v5  ;;  %448 = vmatpush1.bf16.msra.mxu0 %v2219_v21 }
  0x2b   :  { %449 = vmatprep.subr.bf16.mxu0 %v2225_v22 }
  0x2c   :  { %1804 = vmatmul.mubr.bf16.vlgmr.msra.gmra.mrb[4].mxu1 %v2077_v3 }
  0x2d   :  { %1808 = vmatpush3.bf16.msra.mxu1 %v2238_v25  ;;  %1815 = vmatprep.mubr.msk.bf16.mxu1 %vm2079_vm0, %v2078_v5 }
  0x2e   :  { %1809 = vmatprep.subr.bf16.mxu1 %v2078_v5  ;;  %450 = vmatpush1.bf16.msra.mxu0 %v2243_v26 }
  0x2f   :  { %1672 = vmatprep.subr.msk.bf16.mxu0 %vm146_vm1, %v2248_v27 }
  0x31   :  { %1810 = vmatpush3.bf16.msra.mxu1 %v2255_v29 }
  0x32   :  { %1811 = vmatprep.subr.bf16.mxu1 %v2078_v5  ;;  %452 = vmatpush1.bf16.msra.mxu0 %v2264_v30 }
  0x33   :  { %569 = vmatprep.subr.bf16.mxu0 %v2187_v13 }
  0x35   :  { %1812 = vmatpush3.bf16.msra.mxu1 %v2270_v31 }
  0x36   :  { %1813 = vmatprep.subr.bf16.mxu1 %v2078_v5 }
  0x39   :  { %1814 = vmatpush3.bf16.msra.mxu1 %v2282_v33 }
  0x3a   :  { %1819 = vmatprep.subr.bf16.mxu1 %v2078_v5 }
  0xe8   :  { %v190_v41 = vpop.f32.mrb[0].mxu0 }
  0xe9   :  { %v191_v43 = vadd.f32 %v190_v41, %v69_v39  ;;  %v192_v44 = vpop.f32.mrb[1].mxu0 }
  0xea   :  { %v193_v45 = vadd.f32 %v192_v44, %v73_v40  ;;  %v194_v46 = vpop.f32.mrb[2].mxu0 }
  0xeb   :  { %240 = vst [vmem:[#allocation2] sm:$0xff] %v191_v43  ;;  %v195_v47 = vadd.f32 %v194_v46, %v69_v39  ;;  %v196_v48 = vpop.f32.mrb[3].mxu0 }
  0xec   :  { %241 = vst [vmem:[#allocation2 + $0x8] sm:$0xff] %v193_v45  ;;  %v197_v49 = vadd.f32 %v196_v48, %v73_v40 }
  0xed   :  { %243 = vst [vmem:[#allocation2 + $0x18] sm:$0xff] %v195_v47 }
  0xee   :  { %244 = vst [vmem:[#allocation2 + $0x20] sm:$0xff] %v197_v49 }
  0xef   :  { %v233_v51 = vpop.f32.mrb[0].mxu1 }
  0xf0   :  { %v234_v52 = vadd.f32 %v233_v51, %v77_v50  ;;  %v1793_v53 = vpop.f32.mrb[1].mxu1 }
  0xf1   :  { %v236_v54 = vpop.f32.mrb[2].mxu1 }
  0xf2   :  { %242 = vst [vmem:[#allocation2 + $0x10] sm:$0xff] %v234_v52  ;;  %v237_v55 = vadd.f32 %v236_v54, %v77_v50  ;;  %v1794_v56 = vpop.f32.mrb[3].mxu1  ;;  %v410_v58 = vld [vmem:[#allocation2] sm:$0x3]  ;;  %v526_v47 = vld [vmem:[#allocation2] sm:$0xc] }
  0xf3   :  { %v418_v63 = vld [vmem:[#allocation2 + $0x8] sm:$0x3]  ;;  %v537_v52 = vld [vmem:[#allocation2 + $0x8] sm:$0xc] }
  0xf4   :  { %245 = vst [vmem:[#allocation2 + $0x28] sm:$0xff] %v237_v55 }
  0xf8   :  { %v363_v57 = vpop.f32.mrb[4].mxu0 }
  0xf9   :  { %v411_v59 = vadd.f32 %v410_v58, %v363_v57  ;;  %v365_v60 = vpop.f32.mrb[5].mxu0  ;;  %v426_v18 = vld [vmem:[#allocation2 + $0x10] sm:$0x3] }
  0xfa   :  { %v367_v61 = vpop.f32.mrb[6].mxu0  ;;  %v419_v1 = vadd.f32 %v418_v63, %v365_v60 }
  0xfb   :  { %v1669_v62 = vmul.f32 -1.442695, %v411_v59  ;;  %v368_v0 = vpop.f32.mrb[7].mxu0 }
  0xfc   :  { %v1670_v4 = vmul.f32 -1.442695, %v419_v1 }
  0xfd   :  { %1973 = vpow2.f32 %v1669_v62 }
  0xfe   :  { %1975 = vpow2.f32 %v1670_v4 }
  0xff   :  { %v404_v2 = vpop.f32.mrb[4].mxu1 }
 0x100   :  { %v1805_v6 = vpop.f32.mrb[5].mxu1  ;;  %v433_v15 = vadd.f32 %v2324_v12, %v404_v2 }
 0x101   :  { %v407_v7 = vpop.f32.mrb[6].mxu1  ;;  %v548_v6 = vld [vmem:[#allocation2 + $0x10] sm:$0xc] }
 0x102   :  { %v1806_v8 = vpop.f32.mrb[7].mxu1 }
 0x107   :  { %v1974_v9 = vpop.eup %1973 }
 0x108   :  { %v415_v10 = vadd.f32 1.0, %v1974_v9  ;;  %v1976_v11 = vpop.eup %1975 }
 0x109   :  { %v423_v14 = vadd.f32 1.0, %v1976_v11 }
 0x10a   :  { %1977 = vrcp.f32 %v415_v10 }
 0x10b   :  { %1979 = vrcp.f32 %v423_v14 }
 0x114   :  { %v1978_v16 = vpop.eup %1977 }
 0x115   :  { %v434_v17 = vmul.f32 %v1978_v16, %v433_v15  ;;  %v1980_v24 = vpop.eup %1979 }
 0x116   :  { %v437_v28 = vsub.f32 1.0, %v1980_v24  ;;  %v439_v37 = vmul.f32 0.0, %v1980_v24 }
 0x117   :  { %v435_v23 = vadd.f32 %v434_v17, %v426_v18 }
 0x119   :  { %1981 = vtanh.f32 %v435_v23 }
 0x123   :  { %v1982_v32 = vpop.eup %1981 }
 0x124   :  { %v438_v39 = vmul.f32 %v1982_v32, %v437_v28  ;;  %v650_v32 = vld [vmem:[#allocation2] sm:$0x30] }
 0x126   :  { %v440_v40 = vadd.f32 %v439_v37, %v438_v39 }
 0x128   :  { %v441_v41 = vpack.c.bf16 %v440_v40, %v440_v40  ;;  %v559_v1 = vrot.slane %v440_v40, 6 }
 0x12a   :  { %1673 = vmatmul.mubr.msk.bf16.vlgmr.msra.gmra.mrb[8].mxu0 %vm142_vm2, %v441_v41  ;;  %1816 = vmatmul.mubr.msk.bf16.vlgmr.msra.gmra.mrb[8].mxu1 %vm142_vm2, %v441_v41 }
 0x12b   :  { %570 = vmatpush1.bf16.msra.mxu0 %v2207_v19  ;;  %1820 = vmatpush3.bf16.msra.mxu1 %v2238_v25 }
 0x12c   :  { %571 = vmatprep.subr.bf16.mxu0 %v2214_v20  ;;  %1821 = vmatprep.subr.bf16.mxu1 %v2078_v5 }
 0x12d   :  { %601 = vmatprep.mubr.bf16.mxu0 %v2077_v3  ;;  %1827 = vmatprep.mubr.msk.bf16.mxu1 %vm2079_vm0, %v2078_v5 }
 0x12f   :  { %572 = vmatpush1.bf16.msra.mxu0 %v2219_v21  ;;  %1822 = vmatpush3.bf16.msra.mxu1 %v2255_v29 }
 0x130   :  { %573 = vmatprep.subr.bf16.mxu0 %v2225_v22  ;;  %1823 = vmatprep.subr.bf16.mxu1 %v2078_v5 }
 0x133   :  { %574 = vmatpush1.bf16.msra.mxu0 %v2243_v26  ;;  %1824 = vmatpush3.bf16.msra.mxu1 %v2270_v31 }
 0x134   :  { %1677 = vmatprep.subr.msk.bf16.mxu0 %vm146_vm1, %v2248_v27  ;;  %1825 = vmatprep.subr.bf16.mxu1 %v2078_v5 }
 0x137   :  { %576 = vmatpush1.bf16.msra.mxu0 %v2264_v30  ;;  %1826 = vmatpush3.bf16.msra.mxu1 %v2282_v33 }
 0x138   :  { %693 = vmatprep.subr.bf16.mxu0 %v2187_v13  ;;  %1831 = vmatprep.subr.bf16.mxu1 %v2078_v5 }
 0x1fd   :  { %v479_v42 = vpop.f32.mrb[8].mxu0  ;;  %v520_v43 = vpop.f32.mrb[8].mxu1 }
 0x1fe   :  { %v528_v44 = vrot.slane %v479_v42, 6  ;;  %v481_v45 = vpop.f32.mrb[9].mxu0  ;;  %v1817_v46 = vpop.f32.mrb[9].mxu1  ;;  %v549_v62 = vadd.f32 %v2324_v12, %v520_v43  ;;  %v661_v42 = vld [vmem:[#allocation2 + $0x8] sm:$0x30] }
 0x1ff   :  { %v539_v48 = vrot.slane %v481_v45, 6  ;;  %v483_v49 = vpop.f32.mrb[10].mxu0  ;;  %v523_v50 = vpop.f32.mrb[10].mxu1 }
 0x200   :  { %v530_v51 = vadd.f32 %v528_v44, %v526_v47  ;;  %v484_v53 = vpop.f32.mrb[11].mxu0  ;;  %v1818_v54 = vpop.f32.mrb[11].mxu1  ;;  %v551_v63 = vrot.slane %v549_v62, 6 }
 0x201   :  { %v541_v55 = vadd.f32 %v539_v48, %v537_v52 }
 0x202   :  { %v1675_v56 = vmul.f32 -1.442695, %v530_v51 }
 0x203   :  { %v1676_v57 = vmul.f32 -1.442695, %v541_v55 }
 0x204   :  { %1983 = vpow2.f32 %v1675_v56 }
 0x205   :  { %1985 = vpow2.f32 %v1676_v57 }
 0x20e   :  { %v1984_v58 = vpop.eup %1983 }
 0x20f   :  { %v1986_v59 = vpop.eup %1985  ;;  %v534_v60 = vadd.f32 1.0, %v1984_v58  ;;  %v672_v58 = vld [vmem:[#allocation2 + $0x10] sm:$0x30] }
 0x210   :  { %v545_v61 = vadd.f32 1.0, %v1986_v59 }
 0x211   :  { %1987 = vrcp.f32 %v534_v60 }
 0x212   :  { %1989 = vrcp.f32 %v545_v61 }
 0x21b   :  { %v1988_v0 = vpop.eup %1987 }
 0x21c   :  { %v1990_v2 = vpop.eup %1989  ;;  %v553_v4 = vmul.f32 %v1988_v0, %v551_v63 }
 0x21d   :  { %v561_v7 = vmul.f32 %v1990_v2, %v559_v1  ;;  %v556_v9 = vsub.f32 1.0, %v1990_v2 }
 0x21e   :  { %v554_v8 = vadd.f32 %v553_v4, %v548_v6 }
 0x220   :  { %1991 = vtanh.f32 %v554_v8 }
 0x22a   :  { %v1992_v10 = vpop.eup %1991 }
 0x22b   :  { %v557_v11 = vmul.f32 %v1992_v10, %v556_v9  ;;  %v774_v10 = vld [vmem:[#allocation2] sm:$0xc0] }
 0x22d   :  { %v562_v14 = vadd.f32 %v561_v7, %v557_v11 }
 0x22f   :  { %v563_v15 = vpack.c.bf16 %v562_v14, %v562_v14  ;;  %v683_v55 = vrot.slane %v562_v14, 6 }
 0x231   :  { %v565_v16 = vrot.slane %v563_v15, 1 }
 0x233   :  { %1678 = vmatmul.mubr.msk.bf16.vlgmr.msra.gmra.mrb[12].mxu0 %vm142_vm2, %v565_v16  ;;  %1828 = vmatmul.mubr.msk.bf16.vlgmr.msra.gmra.mrb[12].mxu1 %vm142_vm2, %v565_v16 }
 0x234   :  { %694 = vmatpush1.bf16.msra.mxu0 %v2207_v19  ;;  %1832 = vmatpush3.bf16.msra.mxu1 %v2238_v25 }
 0x235   :  { %695 = vmatprep.subr.bf16.mxu0 %v2214_v20  ;;  %1833 = vmatprep.subr.bf16.mxu1 %v2078_v5 }
 0x236   :  { %725 = vmatprep.mubr.bf16.mxu0 %v2077_v3  ;;  %1839 = vmatprep.mubr.msk.bf16.mxu1 %vm2079_vm0, %v2078_v5 }
 0x238   :  { %696 = vmatpush1.bf16.msra.mxu0 %v2219_v21  ;;  %1834 = vmatpush3.bf16.msra.mxu1 %v2255_v29 }
 0x239   :  { %697 = vmatprep.subr.bf16.mxu0 %v2225_v22  ;;  %1835 = vmatprep.subr.bf16.mxu1 %v2078_v5 }
 0x23c   :  { %698 = vmatpush1.bf16.msra.mxu0 %v2243_v26  ;;  %1836 = vmatpush3.bf16.msra.mxu1 %v2270_v31 }
 0x23d   :  { %1682 = vmatprep.subr.msk.bf16.mxu0 %vm146_vm1, %v2248_v27  ;;  %1837 = vmatprep.subr.bf16.mxu1 %v2078_v5 }
 0x240   :  { %700 = vmatpush1.bf16.msra.mxu0 %v2264_v30  ;;  %1838 = vmatpush3.bf16.msra.mxu1 %v2282_v33 }
 0x241   :  { %817 = vmatprep.subr.bf16.mxu0 %v2187_v13  ;;  %1843 = vmatprep.subr.bf16.mxu1 %v2078_v5 }
 0x306   :  { %v603_v17 = vpop.f32.mrb[12].mxu0  ;;  %v644_v18 = vpop.f32.mrb[12].mxu1 }
 0x307   :  { %v652_v23 = vrot.slane %v603_v17, 4  ;;  %v605_v24 = vpop.f32.mrb[13].mxu0  ;;  %v1829_v28 = vpop.f32.mrb[13].mxu1  ;;  %v673_v52 = vadd.f32 %v2324_v12, %v644_v18  ;;  %v785_v17 = vld [vmem:[#allocation2 + $0x8] sm:$0xc0] }
 0x308   :  { %v663_v37 = vrot.slane %v605_v24, 4  ;;  %v607_v39 = vpop.f32.mrb[14].mxu0  ;;  %v647_v40 = vpop.f32.mrb[14].mxu1 }
 0x309   :  { %v654_v41 = vadd.f32 %v652_v23, %v650_v32  ;;  %v608_v43 = vpop.f32.mrb[15].mxu0  ;;  %v1830_v44 = vpop.f32.mrb[15].mxu1  ;;  %v675_v53 = vrot.slane %v673_v52, 4 }
 0x30a   :  { %v665_v45 = vadd.f32 %v663_v37, %v661_v42 }
 0x30b   :  { %v1680_v46 = vmul.f32 -1.442695, %v654_v41 }
 0x30c   :  { %v1681_v47 = vmul.f32 -1.442695, %v665_v45 }
 0x30d   :  { %1993 = vpow2.f32 %v1680_v46 }
 0x30e   :  { %1995 = vpow2.f32 %v1681_v47 }
 0x317   :  { %v1994_v48 = vpop.eup %1993 }
 0x318   :  { %v1996_v49 = vpop.eup %1995  ;;  %v658_v50 = vadd.f32 1.0, %v1994_v48  ;;  %v796_v48 = vld [vmem:[#allocation2 + $0x10] sm:$0xc0] }
 0x319   :  { %v669_v51 = vadd.f32 1.0, %v1996_v49 }
 0x31a   :  { %1997 = vrcp.f32 %v658_v50 }
 0x31b   :  { %1999 = vrcp.f32 %v669_v51 }
 0x324   :  { %v1998_v54 = vpop.eup %1997 }
 0x325   :  { %v2000_v56 = vpop.eup %1999  ;;  %v677_v57 = vmul.f32 %v1998_v54, %v675_v53 }
 0x326   :  { %v685_v59 = vmul.f32 %v2000_v56, %v683_v55  ;;  %v680_v61 = vsub.f32 1.0, %v2000_v56 }
 0x327   :  { %v678_v60 = vadd.f32 %v677_v57, %v672_v58  ;;  %v898_v58 = vld [vmem:[#allocation2 + $0x18] sm:$0x3] }
 0x329   :  { %2001 = vtanh.f32 %v678_v60 }
 0x333   :  { %v2002_v62 = vpop.eup %2001 }
 0x334   :  { %v681_v63 = vmul.f32 %v2002_v62, %v680_v61  ;;  %v906_v62 = vld [vmem:[#allocation2 + $0x20] sm:$0x3] }
 0x336   :  { %v686_v0 = vadd.f32 %v685_v59, %v681_v63 }
 0x338   :  { %v687_v1 = vpack.c.bf16 %v686_v0, %v686_v0  ;;  %v807_v45 = vrot.slane %v686_v0, 6 }
 0x33a   :  { %v689_v2 = vrot.slane %v687_v1, 2 }
 0x33c   :  { %1683 = vmatmul.mubr.msk.bf16.vlgmr.msra.gmra.mrb[16].mxu0 %vm142_vm2, %v689_v2  ;;  %1840 = vmatmul.mubr.msk.bf16.vlgmr.msra.gmra.mrb[16].mxu1 %vm142_vm2, %v689_v2 }
 0x33d   :  { %818 = vmatpush1.bf16.msra.mxu0 %v2207_v19  ;;  %1844 = vmatpush3.bf16.msra.mxu1 %v2238_v25 }
 0x33e   :  { %819 = vmatprep.subr.bf16.mxu0 %v2214_v20  ;;  %1845 = vmatprep.subr.bf16.mxu1 %v2078_v5 }
 0x33f   :  { %849 = vmatprep.mubr.bf16.mxu0 %v2077_v3  ;;  %1851 = vmatprep.mubr.msk.bf16.mxu1 %vm2079_vm0, %v2078_v5 }
 0x341   :  { %820 = vmatpush1.bf16.msra.mxu0 %v2219_v21  ;;  %1846 = vmatpush3.bf16.msra.mxu1 %v2255_v29 }
 0x342   :  { %821 = vmatprep.subr.bf16.mxu0 %v2225_v22  ;;  %1847 = vmatprep.subr.bf16.mxu1 %v2078_v5 }
 0x345   :  { %822 = vmatpush1.bf16.msra.mxu0 %v2243_v26  ;;  %1848 = vmatpush3.bf16.msra.mxu1 %v2270_v31 }
 0x346   :  { %1687 = vmatprep.subr.msk.bf16.mxu0 %vm146_vm1, %v2248_v27  ;;  %1849 = vmatprep.subr.bf16.mxu1 %v2078_v5 }
 0x349   :  { %824 = vmatpush1.bf16.msra.mxu0 %v2264_v30  ;;  %1850 = vmatpush3.bf16.msra.mxu1 %v2282_v33 }
 0x34a   :  { %930 = vmatprep.subr.bf16.mxu0 %v2187_v13  ;;  %1855 = vmatprep.subr.bf16.mxu1 %v2078_v5 }
 0x40f   :  { %v727_v4 = vpop.f32.mrb[16].mxu0  ;;  %v768_v6 = vpop.f32.mrb[16].mxu1 }
 0x410   :  { %v776_v7 = vrot.slane %v727_v4, 2  ;;  %v729_v8 = vpop.f32.mrb[17].mxu0  ;;  %v1841_v9 = vpop.f32.mrb[17].mxu1  ;;  %v797_v42 = vadd.f32 %v2324_v12, %v768_v6 }
 0x411   :  { %v787_v11 = vrot.slane %v729_v8, 2  ;;  %v731_v14 = vpop.f32.mrb[18].mxu0  ;;  %v771_v15 = vpop.f32.mrb[18].mxu1 }
 0x412   :  { %v778_v16 = vadd.f32 %v776_v7, %v774_v10  ;;  %v732_v18 = vpop.f32.mrb[19].mxu0  ;;  %v1842_v23 = vpop.f32.mrb[19].mxu1  ;;  %v799_v43 = vrot.slane %v797_v42, 2 }
 0x413   :  { %v789_v24 = vadd.f32 %v787_v11, %v785_v17 }
 0x414   :  { %v1685_v28 = vmul.f32 -1.442695, %v778_v16 }
 0x415   :  { %v1686_v32 = vmul.f32 -1.442695, %v789_v24  ;;  %v914_v24 = vld [vmem:[#allocation2 + $0x28] sm:$0x3] }
 0x416   :  { %2003 = vpow2.f32 %v1685_v28 }
 0x417   :  { %2005 = vpow2.f32 %v1686_v32 }
 0x420   :  { %v2004_v37 = vpop.eup %2003 }
 0x421   :  { %v2006_v39 = vpop.eup %2005  ;;  %v782_v40 = vadd.f32 1.0, %v2004_v37 }
 0x422   :  { %v793_v41 = vadd.f32 1.0, %v2006_v39 }
 0x423   :  { %2007 = vrcp.f32 %v782_v40 }
 0x424   :  { %2009 = vrcp.f32 %v793_v41 }
 0x42d   :  { %v2008_v44 = vpop.eup %2007 }
 0x42e   :  { %v2010_v46 = vpop.eup %2009  ;;  %v801_v47 = vmul.f32 %v2008_v44, %v799_v43 }
 0x42f   :  { %v809_v49 = vmul.f32 %v2010_v46, %v807_v45  ;;  %v804_v51 = vsub.f32 1.0, %v2010_v46 }
 0x430   :  { %v802_v50 = vadd.f32 %v801_v47, %v796_v48  ;;  %v1011_v48 = vld [vmem:[#allocation2 + $0x18] sm:$0xc] }
 0x432   :  { %2011 = vtanh.f32 %v802_v50 }
 0x43c   :  { %v2012_v52 = vpop.eup %2011 }
 0x43d   :  { %v805_v53 = vmul.f32 %v2012_v52, %v804_v51 }
 0x43f   :  { %v810_v54 = vadd.f32 %v809_v49, %v805_v53  ;;  %v1022_v53 = vld [vmem:[#allocation2 + $0x20] sm:$0xc] }
 0x441   :  { %v811_v55 = vpack.c.bf16 %v810_v54, %v810_v54  ;;  %v922_v17 = vrot.slane %v810_v54, 6 }
 0x443   :  { %v813_v56 = vrot.slane %v811_v55, 3 }
 0x445   :  { %1688 = vmatmul.mubr.msk.bf16.vlgmr.msra.gmra.mrb[20].mxu0 %vm142_vm2, %v813_v56  ;;  %1852 = vmatmul.mubr.msk.bf16.vlgmr.msra.gmra.mrb[20].mxu1 %vm142_vm2, %v813_v56 }
 0x446   :  { %931 = vmatpush1.bf16.msra.mxu0 %v2207_v19  ;;  %1856 = vmatpush3.bf16.msra.mxu1 %v2238_v25 }
 0x447   :  { %932 = vmatprep.subr.bf16.mxu0 %v2214_v20  ;;  %1857 = vmatprep.subr.bf16.mxu1 %v2078_v5 }
 0x448   :  { %962 = vmatprep.mubr.bf16.mxu0 %v2077_v3  ;;  %1863 = vmatprep.mubr.msk.bf16.mxu1 %vm2079_vm0, %v2078_v5 }
 0x44a   :  { %933 = vmatpush1.bf16.msra.mxu0 %v2219_v21  ;;  %1858 = vmatpush3.bf16.msra.mxu1 %v2255_v29 }
 0x44b   :  { %934 = vmatprep.subr.bf16.mxu0 %v2225_v22  ;;  %1859 = vmatprep.subr.bf16.mxu1 %v2078_v5 }
 0x44e   :  { %935 = vmatpush1.bf16.msra.mxu0 %v2243_v26  ;;  %1860 = vmatpush3.bf16.msra.mxu1 %v2270_v31 }
 0x44f   :  { %1692 = vmatprep.subr.msk.bf16.mxu0 %vm146_vm1, %v2248_v27  ;;  %1861 = vmatprep.subr.bf16.mxu1 %v2078_v5 }
 0x452   :  { %937 = vmatpush1.bf16.msra.mxu0 %v2264_v30  ;;  %1862 = vmatpush3.bf16.msra.mxu1 %v2282_v33 }
 0x453   :  { %1054 = vmatprep.subr.bf16.mxu0 %v2187_v13  ;;  %1867 = vmatprep.subr.bf16.mxu1 %v2078_v5 }
 0x518   :  { %v851_v57 = vpop.f32.mrb[20].mxu0  ;;  %v892_v59 = vpop.f32.mrb[20].mxu1 }
 0x519   :  { %v899_v60 = vadd.f32 %v898_v58, %v851_v57  ;;  %v853_v61 = vpop.f32.mrb[21].mxu0  ;;  %v1853_v63 = vpop.f32.mrb[21].mxu1  ;;  %v915_v15 = vadd.f32 %v2324_v12, %v892_v59 }
 0x51a   :  { %v907_v0 = vadd.f32 %v906_v62, %v853_v61  ;;  %v855_v1 = vpop.f32.mrb[22].mxu0  ;;  %v895_v2 = vpop.f32.mrb[22].mxu1 }
 0x51b   :  { %v1690_v4 = vmul.f32 -1.442695, %v899_v60  ;;  %v856_v6 = vpop.f32.mrb[23].mxu0  ;;  %v1854_v7 = vpop.f32.mrb[23].mxu1 }
 0x51c   :  { %v1691_v8 = vmul.f32 -1.442695, %v907_v0  ;;  %v1033_v6 = vld [vmem:[#allocation2 + $0x28] sm:$0xc] }
 0x51d   :  { %2013 = vpow2.f32 %v1690_v4 }
 0x51e   :  { %2015 = vpow2.f32 %v1691_v8 }
 0x527   :  { %v2014_v9 = vpop.eup %2013 }
 0x528   :  { %v2016_v10 = vpop.eup %2015  ;;  %v903_v11 = vadd.f32 1.0, %v2014_v9 }
 0x529   :  { %v911_v14 = vadd.f32 1.0, %v2016_v10 }
 0x52a   :  { %2017 = vrcp.f32 %v903_v11 }
 0x52b   :  { %2019 = vrcp.f32 %v911_v14 }
 0x534   :  { %v2018_v16 = vpop.eup %2017 }
 0x535   :  { %v2020_v18 = vpop.eup %2019  ;;  %v916_v23 = vmul.f32 %v2018_v16, %v915_v15 }
 0x536   :  { %v924_v28 = vmul.f32 %v2020_v18, %v922_v17  ;;  %v919_v37 = vsub.f32 1.0, %v2020_v18  ;;  %v1146_v17 = vld [vmem:[#allocation2 + $0x20] sm:$0x30] }
 0x537   :  { %v917_v32 = vadd.f32 %v916_v23, %v914_v24 }
 0x539   :  { %2021 = vtanh.f32 %v917_v32 }
 0x543   :  { %v2022_v39 = vpop.eup %2021 }
 0x544   :  { %v920_v40 = vmul.f32 %v2022_v39, %v919_v37 }
 0x546   :  { %v925_v41 = vadd.f32 %v924_v28, %v920_v40 }
 0x548   :  { %v926_v42 = vpack.c.bf16 %v925_v41, %v925_v41  ;;  %v1044_v1 = vrot.slane %v925_v41, 6 }
 0x54a   :  { %1693 = vmatmul.mubr.msk.bf16.vlgmr.msra.gmra.mrb[24].mxu0 %vm142_vm2, %v926_v42  ;;  %1864 = vmatmul.mubr.msk.bf16.vlgmr.msra.gmra.mrb[24].mxu1 %vm142_vm2, %v926_v42 }
 0x54b   :  { %1055 = vmatpush1.bf16.msra.mxu0 %v2207_v19  ;;  %1868 = vmatpush3.bf16.msra.mxu1 %v2238_v25 }
 0x54c   :  { %1056 = vmatprep.subr.bf16.mxu0 %v2214_v20  ;;  %1869 = vmatprep.subr.bf16.mxu1 %v2078_v5 }
 0x54d   :  { %1086 = vmatprep.mubr.bf16.mxu0 %v2077_v3  ;;  %1875 = vmatprep.mubr.msk.bf16.mxu1 %vm2079_vm0, %v2078_v5 }
 0x54f   :  { %1057 = vmatpush1.bf16.msra.mxu0 %v2219_v21  ;;  %1870 = vmatpush3.bf16.msra.mxu1 %v2255_v29 }
 0x550   :  { %1058 = vmatprep.subr.bf16.mxu0 %v2225_v22  ;;  %1871 = vmatprep.subr.bf16.mxu1 %v2078_v5 }
 0x553   :  { %1059 = vmatpush1.bf16.msra.mxu0 %v2243_v26  ;;  %1872 = vmatpush3.bf16.msra.mxu1 %v2270_v31 }
 0x554   :  { %1697 = vmatprep.subr.msk.bf16.mxu0 %vm146_vm1, %v2248_v27  ;;  %1873 = vmatprep.subr.bf16.mxu1 %v2078_v5 }
 0x557   :  { %1061 = vmatpush1.bf16.msra.mxu0 %v2264_v30  ;;  %1874 = vmatpush3.bf16.msra.mxu1 %v2282_v33 }
 0x558   :  { %1178 = vmatprep.subr.bf16.mxu0 %v2187_v13  ;;  %1879 = vmatprep.subr.bf16.mxu1 %v2078_v5 }
 0x61d   :  { %v964_v43 = vpop.f32.mrb[24].mxu0  ;;  %v1005_v44 = vpop.f32.mrb[24].mxu1 }
 0x61e   :  { %v1013_v45 = vrot.slane %v964_v43, 6  ;;  %v966_v46 = vpop.f32.mrb[25].mxu0  ;;  %v1865_v47 = vpop.f32.mrb[25].mxu1  ;;  %v1034_v62 = vadd.f32 %v2324_v12, %v1005_v44 }
 0x61f   :  { %v1024_v49 = vrot.slane %v966_v46, 6  ;;  %v968_v50 = vpop.f32.mrb[26].mxu0  ;;  %v1008_v51 = vpop.f32.mrb[26].mxu1  ;;  %v1157_v46 = vld [vmem:[#allocation2 + $0x28] sm:$0x30] }
 0x620   :  { %v1015_v52 = vadd.f32 %v1013_v45, %v1011_v48  ;;  %v969_v54 = vpop.f32.mrb[27].mxu0  ;;  %v1866_v55 = vpop.f32.mrb[27].mxu1  ;;  %v1036_v63 = vrot.slane %v1034_v62, 6 }
 0x621   :  { %v1026_v56 = vadd.f32 %v1024_v49, %v1022_v53  ;;  %v1964_v55 = vld [vmem:[%s2555_s6] sm:$0xff]  }
 0x622   :  { %v1695_v57 = vmul.f32 -1.442695, %v1015_v52 }
 0x623   :  { %v1696_v58 = vmul.f32 -1.442695, %v1026_v56  ;;  %v1965_v56 = vld [vmem:[%s2555_s6 + $0x8] sm:$0xff]  }
 0x624   :  { %2023 = vpow2.f32 %v1695_v57  ;;  %v1966_v57 = vld [vmem:[%s2555_s6 + $0x10] sm:$0xff]  }
 0x625   :  { %2025 = vpow2.f32 %v1696_v58  ;;  %v1967_v58 = vld [vmem:[%s2555_s6 + $0x18] ss:$0 sps:$4 sm:$0x11]  }
 0x62e   :  { %v2024_v13 = vpop.eup %2023 }
 0x62f   :  { %v2026_v59 = vpop.eup %2025  ;;  %v1019_v60 = vadd.f32 1.0, %v2024_v13  ;;  %v1338_v13 = vsel %vm146_vm1, %v1967_v58, 0  ;;  %v1713_v58 = vld [vmem:[%s2559_s10] ss:$0 sm:$0xff]  ;;  %s2080_s10 = smov [#allocation4]  }
 0x630   :  { %v1030_v61 = vadd.f32 1.0, %v2026_v59  ;;  %v1968_v59 = vld [vmem:[%s2557_s8] sm:$0xff]  }
 0x631   :  { %2027 = vrcp.f32 %v1019_v60  ;;  %v1969_v60 = vld [vmem:[%s2557_s8 + $0x8] sm:$0xff]  }
 0x632   :  { %2029 = vrcp.f32 %v1030_v61  ;;  %v1970_v61 = vld [vmem:[%s2557_s8 + $0x10] sm:$0xff]  }
 0x63b   :  { %v2028_v0 = vpop.eup %2027 }
 0x63c   :  { %v2030_v2 = vpop.eup %2029  ;;  %v1038_v4 = vmul.f32 %v2028_v0, %v1036_v63 }
 0x63d   :  { %v1046_v7 = vmul.f32 %v2030_v2, %v1044_v1  ;;  %v1041_v9 = vsub.f32 1.0, %v2030_v2 }
 0x63e   :  { %v1039_v8 = vadd.f32 %v1038_v4, %v1033_v6  ;;  %v1259_v4 = vld [vmem:[#allocation2 + $0x18] sm:$0xc0] }
 0x640   :  { %2031 = vtanh.f32 %v1039_v8 }
 0x64a   :  { %v2032_v10 = vpop.eup %2031 }
 0x64b   :  { %v1042_v11 = vmul.f32 %v2032_v10, %v1041_v9  ;;  %v1270_v10 = vld [vmem:[#allocation2 + $0x20] sm:$0xc0] }
 0x64d   :  { %v1047_v14 = vadd.f32 %v1046_v7, %v1042_v11 }
 0x64f   :  { %v1048_v15 = vpack.c.bf16 %v1047_v14, %v1047_v14  ;;  %v1168_v43 = vrot.slane %v1047_v14, 6 }
 0x651   :  { %v1050_v16 = vrot.slane %v1048_v15, 1 }
 0x653   :  { %1698 = vmatmul.mubr.msk.bf16.vlgmr.msra.gmra.mrb[28].mxu0 %vm142_vm2, %v1050_v16  ;;  %1876 = vmatmul.mubr.msk.bf16.vlgmr.msra.gmra.mrb[28].mxu1 %vm142_vm2, %v1050_v16 }
 0x654   :  { %1179 = vmatpush1.bf16.msra.mxu0 %v2207_v19  ;;  %1880 = vmatpush3.bf16.msra.mxu1 %v2238_v25  ;;  %v1135_v25 = vld [vmem:[#allocation2 + $0x18] sm:$0x30] }
 0x655   :  { %1180 = vmatprep.subr.bf16.mxu0 %v2214_v20  ;;  %1881 = vmatprep.subr.bf16.mxu1 %v2078_v5 }
 0x656   :  { %1210 = vmatprep.mubr.bf16.mxu0 %v2077_v3  ;;  %1887 = vmatprep.mubr.msk.bf16.mxu1 %vm2079_vm0, %v2078_v5 }
 0x658   :  { %1181 = vmatpush1.bf16.msra.mxu0 %v2219_v21  ;;  %1882 = vmatpush3.bf16.msra.mxu1 %v2255_v29 }
 0x659   :  { %1182 = vmatprep.subr.bf16.mxu0 %v2225_v22  ;;  %1883 = vmatprep.subr.bf16.mxu1 %v2078_v5 }
 0x65c   :  { %1183 = vmatpush1.bf16.msra.mxu0 %v2243_v26  ;;  %1884 = vmatpush3.bf16.msra.mxu1 %v2270_v31 }
 0x65d   :  { %1702 = vmatprep.subr.msk.bf16.mxu0 %vm146_vm1, %v2248_v27  ;;  %1885 = vmatprep.subr.bf16.mxu1 %v2078_v5 }
 0x660   :  { %1185 = vmatpush1.bf16.msra.mxu0 %v2264_v30  ;;  %1886 = vmatpush3.bf16.msra.mxu1 %v2282_v33 }
 0x661   :  { %1891 = vmatprep.subr.bf16.mxu0 %v2078_v5  ;;  %1903 = vmatprep.subr.bf16.mxu1 %v2078_v5 }
 0x726   :  { %v1088_v3 = vpop.f32.mrb[28].mxu0  ;;  %v1129_v19 = vpop.f32.mrb[28].mxu1 }
 0x727   :  { %v1137_v20 = vrot.slane %v1088_v3, 4  ;;  %v1090_v21 = vpop.f32.mrb[29].mxu0  ;;  %v1877_v22 = vpop.f32.mrb[29].mxu1  ;;  %v1158_v40 = vadd.f32 %v2324_v12, %v1129_v19 }
 0x728   :  { %v1148_v26 = vrot.slane %v1090_v21, 4  ;;  %v1092_v29 = vpop.f32.mrb[30].mxu0  ;;  %v1132_v31 = vpop.f32.mrb[30].mxu1 }
 0x729   :  { %v1139_v27 = vadd.f32 %v1137_v20, %v1135_v25  ;;  %v1093_v18 = vpop.f32.mrb[31].mxu0  ;;  %v1878_v23 = vpop.f32.mrb[31].mxu1  ;;  %v1160_v41 = vrot.slane %v1158_v40, 4  ;;  %v1972_v40 = vld [vmem:[%s2558_s9] sm:$0xff]  }
 0x72a   :  { %v1150_v30 = vadd.f32 %v1148_v26, %v1146_v17  ;;  %v1281_v18 = vld [vmem:[#allocation2 + $0x28] sm:$0xc0] }
 0x72b   :  { %v1700_v24 = vmul.f32 -1.442695, %v1139_v27 }
 0x72c   :  { %v1701_v33 = vmul.f32 -1.442695, %v1150_v30 }
 0x72d   :  { %2033 = vpow2.f32 %v1700_v24 }
 0x72e   :  { %2035 = vpow2.f32 %v1701_v33 }
 0x737   :  { %v2034_v28 = vpop.eup %2033 }
 0x738   :  { %v2036_v32 = vpop.eup %2035  ;;  %v1143_v37 = vadd.f32 1.0, %v2034_v28 }
 0x739   :  { %v1154_v39 = vadd.f32 1.0, %v2036_v32 }
 0x73a   :  { %2037 = vrcp.f32 %v1143_v37 }
 0x73b   :  { %2039 = vrcp.f32 %v1154_v39 }
 0x744   :  { %v2038_v42 = vpop.eup %2037 }
 0x745   :  { %v2040_v44 = vpop.eup %2039  ;;  %v1162_v45 = vmul.f32 %v2038_v42, %v1160_v41  ;;  %v1466_v42 = vld [vmem:[%s2550_s1] sm:$0x7] }
 0x746   :  { %v1170_v47 = vmul.f32 %v2040_v44, %v1168_v43  ;;  %v1165_v49 = vsub.f32 1.0, %v2040_v44  ;;  %v1707_v43 = vld [vmem:[%s2556_s7] ss:$0 sm:$0xff] }
 0x747   :  { %v1163_v48 = vadd.f32 %v1162_v45, %v1157_v46 }
 0x749   :  { %2041 = vtanh.f32 %v1163_v48 }
 0x753   :  { %v2042_v50 = vpop.eup %2041 }
 0x754   :  { %v1166_v51 = vmul.f32 %v2042_v50, %v1165_v49 }
 0x756   :  { %v1171_v52 = vadd.f32 %v1170_v47, %v1166_v51  ;;  %v1722_v51 = vld [vmem:[%s2550_s1 + $0x4] sm:$0x7] }
 0x758   :  { %v1172_v53 = vpack.c.bf16 %v1171_v52, %v1171_v52  ;;  %v1292_v31 = vrot.slane %v1171_v52, 6 }
 0x75a   :  { %v1174_v54 = vrot.slane %v1172_v53, 2 }
 0x75c   :  { %1703 = vmatmul.mubr.msk.bf16.vlgmr.msra.gmra.mrb[32].mxu0 %vm142_vm2, %v1174_v54  ;;  %1888 = vmatmul.mubr.msk.bf16.vlgmr.msra.gmra.mrb[32].mxu1 %vm142_vm2, %v1174_v54 }
 0x75d   :  { %1899 = vmatprep.mubr.msk.bf16.mxu0 %vm2079_vm0, %v2078_v5  ;;  %1911 = vmatprep.mubr.msk.bf16.mxu1 %vm2079_vm0, %v2078_v5 }
 0x75e   :  { %1892 = vmatpush3.bf16.msra.mxu0 %v1964_v55  ;;  %1904 = vmatpush3.bf16.msra.mxu1 %v1968_v59 }
 0x75f   :  { %1893 = vmatprep.subr.bf16.mxu0 %v2078_v5  ;;  %1905 = vmatprep.subr.bf16.mxu1 %v2078_v5 }
 0x762   :  { %1894 = vmatpush3.bf16.msra.mxu0 %v1965_v56  ;;  %1906 = vmatpush3.bf16.msra.mxu1 %v1969_v60  ;;  %v1533_v56 = vld [vmem:[#allocation3] sm:$0x1] }
 0x763   :  { %1895 = vmatprep.subr.bf16.mxu0 %v2078_v5  ;;  %1907 = vmatprep.subr.bf16.mxu1 %v2078_v5 }
 0x764   :  { %1536 = vperm.xlu1 %1931, %v1533_v56  }
 0x766   :  { %1896 = vmatpush3.bf16.msra.mxu0 %v1966_v57  ;;  %1908 = vmatpush3.bf16.msra.mxu1 %v1970_v61  ;;  %v1608_v57 = vld [vmem:[#allocation3] sm:$0x1] }
 0x767   :  { %1897 = vmatprep.subr.bf16.mxu0 %v2078_v5  ;;  %1909 = vmatprep.subr.bf16.mxu1 %v2078_v5 }
 0x768   :  { %1611 = vperm.xlu1 %1931, %v1608_v57  }
 0x76a   :  { %1898 = vmatpush3.bf16.msra.mxu0 %v1338_v13 }
 0x76b   :  { %1915 = vmatprep.subr.bf16.mxu0 %v2078_v5 }
 0x82f   :  { %v1212_v62 = vpop.f32.mrb[32].mxu0  ;;  %v1253_v63 = vpop.f32.mrb[32].mxu1 }
 0x830   :  { %v1261_v0 = vrot.slane %v1212_v62, 2  ;;  %v1214_v1 = vpop.f32.mrb[33].mxu0  ;;  %v1889_v2 = vpop.f32.mrb[33].mxu1  ;;  %v1282_v25 = vadd.f32 %v2324_v12, %v1253_v63  ;;  %v1971_v12 = vld [vmem:[%s2557_s8 + $0x18] ss:$0 sps:$4 sm:$0x11]  }
 0x831   :  { %v1272_v6 = vrot.slane %v1214_v1, 2  ;;  %v1216_v7 = vpop.f32.mrb[34].mxu0  ;;  %v1256_v8 = vpop.f32.mrb[34].mxu1  ;;  %v1421_v41 = vsel %vm146_vm1, %v1971_v12, 0 }
 0x832   :  { %v1263_v9 = vadd.f32 %v1261_v0, %v1259_v4  ;;  %v1217_v11 = vpop.f32.mrb[35].mxu0  ;;  %v1890_v14 = vpop.f32.mrb[35].mxu1  ;;  %v1284_v26 = vrot.slane %v1282_v25, 2  ;;  %1910 = vmatpush3.bf16.msra.mxu1 %v1421_v41  ;;  %v1721_v0 = vld [vmem:[%s2560_s11] ss:$0 sm:$0xff]  ;;  %s1632_s11 = sshll.u32 %s2080_s10, 4  ;;  %s1633_s11 = int_to_ptr.vmem [resolvable:$true] %s1632_s11 }
 0x833   :  { %v1274_v15 = vadd.f32 %v1272_v6, %v1270_v10  ;;  %1921 = vmatprep.subr.bf16.mxu1 %v2078_v5  ;;  %s2053_s5 = scalar_lea.vmem %s1633_s11, 32  ;;  %p2058_p1 = scmp.lt.s32.totalorder %s1633_s11, %s1633_s11 }
 0x834   :  { %v1705_v16 = vmul.f32 -1.442695, %v1263_v9  ;;  %p2054_p0 = scmp.ne.s32.totalorder %s1633_s11, %s2053_s5  ;;  %p2059_p2 = scmp.lt.s32.totalorder %s2053_s5, %s2053_s5 }
 0x835   :  { %v1706_v3 = vmul.f32 -1.442695, %v1274_v15 }
 0x836   :  { %2043 = vpow2.f32 %v1705_v16  ;;  %p2060_p3 = por %p2059_p2, %p2058_p1 }
 0x837   :  { %2045 = vpow2.f32 %v1706_v3  ;;  %v1537_v3 = vpop.permute.xlu1 %1536 }
 0x838   :  { %p2061_p4 = pnand %p2060_p3, %p2054_p0 }
 0x840   :  { %v2044_v19 = vpop.eup %2043 }
 0x841   :  { %v2046_v20 = vpop.eup %2045  ;;  %v1267_v21 = vadd.f32 1.0, %v2044_v19  ;;  %v1546_v19 = vand.u32 127, %v66_v34 }
 0x842   :  { %v1278_v22 = vadd.f32 1.0, %v2046_v20  ;;  %v1542_v20 = vrot.slane %v1537_v3, %v2311_v36 }
 0x843   :  { %2047 = vrcp.f32 %v1267_v21  ;;  %v1612_v21 = vpop.permute.xlu1 %1611 }
 0x844   :  { %2049 = vrcp.f32 %v1278_v22 }
 0x84d   :  { %v2048_v29 = vpop.eup %2047 }
 0x84e   :  { %v2050_v27 = vpop.eup %2049  ;;  %v1286_v17 = vmul.f32 %v2048_v29, %v1284_v26  ;;  %v1617_v26 = vrot.slane %v1612_v21, %v2311_v36 }
 0x84f   :  { %v1294_v23 = vmul.f32 %v2050_v27, %v1292_v31  ;;  %v1289_v24 = vsub.f32 1.0, %v2050_v27 }
 0x850   :  { %v1287_v30 = vadd.f32 %v1286_v17, %v1281_v18 }
 0x852   :  { %2051 = vtanh.f32 %v1287_v30 }
 0x85c   :  { %v2052_v33 = vpop.eup %2051 }
 0x85d   :  { %v1290_v28 = vmul.f32 %v2052_v33, %v1289_v24 }
 0x85f   :  { %v1295_v32 = vadd.f32 %v1294_v23, %v1290_v28 }
 0x861   :  { %v1296_v37 = vpack.c.bf16 %v1295_v32, %v1295_v32 }
 0x863   :  { %v1312_v39 = vrot.slane %v1296_v37, 3 }
 0x865   :  { %1900 = vmatmul.mubr.msk.bf16.vlgmr.msra.gmra.mrb[36].mxu0 %vm142_vm2, %v1312_v39 }
 0x866   :  { %1917 = vmatprep.mubr.msk.bf16.mxu0 %vm2079_vm0, %v2078_v5  ;;  %1916 = vmatpush3.bf16.msra.mxu0 %v1972_v40 }
 0x86d   :  { %1918 = vmatmul.mubr.msk.bf16.vlgmr.msra.gmra.mrb[40].mxu0 %vm1477_vm3, %v1466_v42 }
 0x938   :  { %v1374_v44 = vpop.f32.mrb[36].mxu0 }
 0x939   :  { %v1375_v45 = vadd.f32 %v1707_v43, %v1374_v44  ;;  %v1901_v46 = vpop.f32.mrb[37].mxu0 }
 0x93a   :  { %v1377_v47 = vpop.f32.mrb[38].mxu0 }
 0x93b   :  { %v1380_v48 = vmax.f32 %v1375_v45, 0.0  ;;  %v1902_v49 = vpop.f32.mrb[39].mxu0 }
 0x93d   :  { %v1381_v50 = vpack.c.bf16 %v1380_v48, %v1380_v48 }
 0x93f   :  { %1912 = vmatmul.mubr.msk.bf16.vlgmr.msra.gmra.mrb[36].mxu1 %vm142_vm2, %v1381_v50 }
 0x940   :  { %1922 = vmatpush3.bf16.msra.mxu1 %v1972_v40  ;;  %1923 = vmatprep.mubr.msk.bf16.mxu1 %vm2079_vm0, %v2078_v5  ;;  %v1515_v52 = vpop.f32.mrb[40].mxu0 }
 0x941   :  { %v1919_v53 = vpop.f32.mrb[41].mxu0 }
 0x942   :  { %v1518_v54 = vpop.f32.mrb[42].mxu0 }
 0x943   :  { %v1920_v55 = vpop.f32.mrb[43].mxu0 }
 0x947   :  { %1924 = vmatmul.mubr.msk.bf16.vlgmr.msra.gmra.mrb[40].mxu1 %vm1477_vm3, %v1722_v51 }
 0xa12   :  { %v1457_v13 = vpop.f32.mrb[36].mxu1 }
 0xa13   :  { %v1458_v59 = vadd.f32 %v1713_v58, %v1457_v13  ;;  %v1913_v5 = vpop.f32.mrb[37].mxu1 }
 0xa14   :  { %v1460_v60 = vpop.f32.mrb[38].mxu1 }
 0xa15   :  { %v1470_v61 = vrot.slane %v1458_v59, %v2311_v36  ;;  %v1914_v62 = vpop.f32.mrb[39].mxu1  ;;  %v1559_v2 = vrot.slane %v1458_v59, %v72_v38  ;;  %v1549_v38 = vsub.s32 %v1546_v19, %v2308_v35 }
 0xa17   :  { %v1516_v63 = vadd.f32 %v1515_v52, %v1470_v61 }
 0xa19   :  { %v1521_v1 = vmax.f32 %v1516_v63, 0.0 }
 0xa1a   :  { %v1597_v4 = vpop.f32.mrb[40].mxu1 }
 0xa1b   :  { %v1598_v6 = vadd.f32 %v1597_v4, %v1559_v2  ;;  %v1925_v7 = vpop.f32.mrb[41].mxu1  ;;  %v1528_v8 = vmul.f32 %v1721_v0, %v1521_v1 }
 0xa1c   :  { %v1600_v9 = vpop.f32.mrb[42].mxu1 }
 0xa1d   :  { %v1603_v10 = vmax.f32 %v1598_v6, 0.0  ;;  %v1926_v11 = vpop.f32.mrb[43].mxu1  ;;  %v1530_v14 = vsel %vm1529_vm4, %v1528_v8, 0.0 }
 0xa1e   :  { %1531 = vadd.xlane.f32.xlu0 %v1530_v14 }
 0xa1f   :  { %v1604_v15 = vmul.f32 %v1721_v0, %v1603_v10 }
 0xa21   :  { %v1605_v16 = vsel %vm1529_vm4, %v1604_v15, 0.0 }
 0xa22   :  { %1606 = vadd.xlane.f32.xlu0 %v1605_v16 }
 0xaab   :  { %v1532_v22 = vpop.xlane.xlu0 %1531 }
 0xaac   :  { %v1543_v25 = vadd.f32 %v1542_v20, %v1532_v22 }
 0xaae   :  { %v1550_v29 = vrot.slane %v1543_v25, %v1549_v38 }
 0xaaf   :  { %v1607_v31 = vpop.xlane.xlu0 %1606 }
 0xab0   :  { %v1618_v27 = vadd.f32 %v1617_v26, %v1607_v31  ;;  %1553 = vst.msk [vmem:[#allocation4] sm:$0x1] %vm1552_vm5, %v1550_v29 }
 0xab2   :  { %v1623_v17 = vrot.slane %v1618_v27, %v1549_v38 }
 0xab4   :  { %1625 = vst.msk [vmem:[#allocation4 + $0x1] sm:$0x1] %vm1552_vm5, %v1623_v17 }
 0xab5   :  { %2064 = shalt.err (!%p2061_p4)
}
 0xab6   :  { %s2065_s0 = scalar_lea.hbm %s2562_s13, 32 }
 0xab7   :  { %p2066_p5 = scmp.ne.s32.totalorder %s2562_s13, %s2065_s0  ;;  %p2069_p6 = scmp.lt.u32.totalorder %s2065_s0, %s2562_s13 }
 0xab9   :  { %p2071_p7 = pnand %p2069_p6, %p2066_p5 }
 0xabb   :  { %2074 = shalt.err (!%p2071_p7)
}
 0xabc   :  { %1635 = dma.vmem_to_hbm [thread:$0]  %s1633_s11, 32, %s2562_s13, [#allocation5]  }
 0xabd   :  { %2075 = dma.done.wait [#allocation5], 32  }
 0xabe   :  { %2076 = vsyncadd [#allocation5], 4294967264 }
 0xabf   :  { %1639 = vsyncpa [#allocation5], 1 }

</bundles_post_ra>
